<compile_context>
chip_gen: v6e
topology: v6e:2x2x1
jax: 0.10.0
libtpu: 0.0.40
codegen_flags: <defaults>
</compile_context>

<pallas_src>
import jax
import jax.numpy as jnp
from jax import lax
from jax.experimental import pallas as pl
from jax.experimental.pallas import tpu as pltpu

# ---- toy hyperparameters (proportional to the real module: dim=768, heads=12,
#      head_dim=64, mlp_ratio=4; here dim=128, heads=4, head_dim=32) ----
B = 2           # batch
N = 16          # sequence length (tokens)
C = 128         # embedding dim (multiple of 128 -> lane-dense everywhere)
NUM_HEADS = 4
HEAD_DIM = C // NUM_HEADS     # 32
MLP_RATIO = 4.0
HIDDEN = int(C * MLP_RATIO)   # 512
EPS = 1e-5                    # nn.LayerNorm default eps

MXU_DTYPE = jnp.bfloat16      # matmul-operand dtype (accumulation stays f32)


def _layernorm(x, gamma, beta):
    mu = jnp.mean(x, axis=-1, keepdims=True)
    var = jnp.mean(jnp.square(x - mu), axis=-1, keepdims=True)
    return (x - mu) * lax.rsqrt(var + EPS) * gamma + beta


def _erf(x):
    # Abramowitz & Stegun 7.1.26 polynomial erf (|abs err| < 1.5e-7) built only
    # from exp / mul / add / where, all of which lower cleanly on the TPU
    # VPU/EUP (avoids depending on a lax.erf lowering rule).
    a1, a2, a3, a4, a5 = 0.254829592, -0.284496736, 1.421413741, -1.453152027, 1.061405429
    p = 0.3275911
    sgn = jnp.where(x >= 0.0, 1.0, -1.0)
    ax = jnp.abs(x)
    t = 1.0 / (1.0 + p * ax)
    poly = ((((a5 * t + a4) * t + a3) * t + a2) * t + a1) * t
    return sgn * (1.0 - poly * jnp.exp(-ax * ax))


def _gelu_exact(x):
    # exact (erf) GELU == nn.GELU default, to ~1.5e-7
    return 0.5 * x * (1.0 + _erf(x * (2.0 ** -0.5)))


def block_kernel(x_ref,                     # (N, C)      f32 (one batch element)
                 g1_ref, b1_ref,            # (1, C)      f32
                 wqkv_t_ref,                # (3C, C)     bf16, q rows pre-scaled
                 wproj_ref, bproj_ref,      # (C, C) bf16, (1, C) f32
                 g2_ref, b2_ref,            # (1, C)      f32
                 w1_ref, bfc1_ref,          # (C, HIDDEN) bf16, (1, HIDDEN) f32
                 w2_ref, bfc2_ref,          # (HIDDEN, C) bf16, (1, C) f32
                 o_ref,                     # (N, C)
                 oall_ref):                 # VMEM scratch (N, C) f32: staged head outputs
    x = x_ref[...].astype(jnp.float32)                       # (N, C)

    # ---- norm1 ----
    xn = _layernorm(x, g1_ref[...], b1_ref[...])

    # ---- attention ----
    # qkv in feature-major layout (3C, N): contract the C axis of both operands
    # (no .T materialized); per-head accesses below are sublane row slices.
    qkv_t = lax.dot_general(wqkv_t_ref[...], xn.astype(MXU_DTYPE),
                            (((1,), (1,)), ((), ())),
                            preferred_element_type=jnp.float32)       # (3C, N)

    # Per-head (unrolled, H=4): scores / softmax / AV.  Attention scale is
    # already folded into the q rows of wqkv_t.
    for h in range(NUM_HEADS):
        off = h * HEAD_DIM
        q_t = qkv_t[0 * C + off: 0 * C + off + HEAD_DIM, :]           # (Dh, N)
        k_t = qkv_t[1 * C + off: 1 * C + off + HEAD_DIM, :]           # (Dh, N)
        v_t = qkv_t[2 * C + off: 2 * C + off + HEAD_DIM, :]           # (Dh, N)

        # scores (N, N): contract the head dim (axis 0 of q_t with axis 0 of k_t)
        s = lax.dot_general(q_t.astype(MXU_DTYPE), k_t.astype(MXU_DTYPE),
                            (((0,), (0,)), ((), ())),
                            preferred_element_type=jnp.float32)

        # softmax (f32); denominator via approximate reciprocal on the EUP.
        s = s - jnp.max(s, axis=-1, keepdims=True)
        p = jnp.exp(s)
        p = p * pl.reciprocal(jnp.sum(p, axis=-1, keepdims=True), approx=True)

        # head output (N, Dh): contract the key-token axis (axis 1 of p with axis 1 of v_t)
        o_h = lax.dot_general(p.astype(MXU_DTYPE), v_t.astype(MXU_DTYPE),
                              (((1,), (1,)), ((), ())),
                              preferred_element_type=jnp.float32)

        # stage into the (N, C) scratch at lane offset h*HEAD_DIM
        oall_ref[:, off: off + HEAD_DIM] = o_h

    # one K=C output projection instead of H under-filled K=HEAD_DIM dots
    y = jnp.dot(oall_ref[...].astype(MXU_DTYPE), wproj_ref[...],
                preferred_element_type=jnp.float32) + bproj_ref[...]
    x1 = x + y                                                        # residual 1

    # ---- norm2 + MLP ----
    xn2 = _layernorm(x1, g2_ref[...], b2_ref[...])
    hdn = jnp.dot(xn2.astype(MXU_DTYPE), w1_ref[...],
                  preferred_element_type=jnp.float32) + bfc1_ref[...]
    hdn = _gelu_exact(hdn)
    m = jnp.dot(hdn.astype(MXU_DTYPE), w2_ref[...],
                preferred_element_type=jnp.float32) + bfc2_ref[...]

    o_ref[...] = (x1 + m).astype(o_ref.dtype)


def prepare_block_params(params):
    """One-time parameter preparation (done at init, NOT per forward call):
    transposed qkv weight with the attention scale folded into the q rows,
    bf16 weight storage (halves weight DMA; accumulation stays f32)."""
    (g1, b1, wqkv, wproj, bproj, g2, b2, w1, bfc1, w2, bfc2) = params
    scale = HEAD_DIM ** -0.5
    wqkv_t = wqkv.T                                   # (3C, C) f32
    wqkv_t = wqkv_t.at[:C, :].multiply(scale)         # fold scale into q rows
    return (g1, b1,
            wqkv_t.astype(MXU_DTYPE),
            wproj.astype(MXU_DTYPE), bproj,
            g2, b2,
            w1.astype(MXU_DTYPE), bfc1,
            w2.astype(MXU_DTYPE), bfc2)


@jax.jit
def vit_block(x, prepped):
    (g1, b1, wqkv_t, wproj, bproj, g2, b2, w1, bfc1, w2, bfc2) = prepped
    bx, nx, cx = x.shape
    assert nx == N and cx == C

    def const(shape):
        return pl.BlockSpec(shape, lambda b: (0,) * len(shape))

    in_specs = [
        pl.BlockSpec((None, nx, cx), lambda b: (b, 0, 0)),   # x: one batch element/step
        const((1, cx)), const((1, cx)),                      # norm1 gamma/beta
        const((3 * cx, cx)),                                 # qkv weight (feature-major)
        const((cx, cx)), const((1, cx)),                     # proj weight/bias
        const((1, cx)), const((1, cx)),                      # norm2 gamma/beta
        const((cx, HIDDEN)), const((1, HIDDEN)),             # fc1 weight/bias
        const((HIDDEN, cx)), const((1, cx)),                 # fc2 weight/bias
    ]

    # Advisory cost estimate matching the actual work (B*H*N^2 attention,
    # weights DMA'd once thanks to constant-index BlockSpecs).
    flops = (2 * bx * nx * cx * 3 * cx                       # qkv
             + 2 * bx * NUM_HEADS * nx * nx * HEAD_DIM * 2   # scores + AV
             + 2 * bx * nx * cx * cx                         # proj
             + 2 * bx * nx * cx * HIDDEN * 2)                # mlp
    transcendentals = (bx * NUM_HEADS * nx * nx              # softmax exp
                       + bx * nx * HIDDEN                    # gelu exp
                       + 2 * bx * nx + bx * NUM_HEADS * nx)  # rsqrt + recip
    weight_bytes = sum(int(a.size) * a.dtype.itemsize for a in
                       (g1, b1, wqkv_t, wproj, bproj, g2, b2, w1, bfc1, w2, bfc2))
    bytes_accessed = 2 * int(x.size) * x.dtype.itemsize + weight_bytes

    return pl.pallas_call(
        block_kernel,
        out_shape=jax.ShapeDtypeStruct((bx, nx, cx), x.dtype),
        grid=(bx,),
        in_specs=in_specs,
        out_specs=pl.BlockSpec((None, nx, cx), lambda b: (b, 0, 0)),
        scratch_shapes=[pltpu.VMEM((nx, cx), jnp.float32)],
        compiler_params=pltpu.CompilerParams(
            dimension_semantics=("parallel",),
            vmem_limit_bytes=32 * 1024 * 1024),
        cost_estimate=pl.CostEstimate(
            flops=int(flops),
            transcendentals=int(transcendentals),
            bytes_accessed=int(bytes_accessed)),
    )(x, g1, b1, wqkv_t, wproj, bproj, g2, b2, w1, bfc1, w2, bfc2)


def reference_block(x, params):
    """Pure-JAX f32 reference matching the PyTorch Block.forward (eval mode)."""
    (g1, b1, wqkv, wproj, bproj, g2, b2, w1, bfc1, w2, bfc2) = params
    g1, b1, bproj, g2, b2, bfc1, bfc2 = (a[0] for a in (g1, b1, bproj, g2, b2, bfc1, bfc2))

    def ln(t, g, b):
        mu = jnp.mean(t, -1, keepdims=True)
        var = jnp.mean((t - mu) ** 2, -1, keepdims=True)
        return (t - mu) / jnp.sqrt(var + EPS) * g + b

    bx, nx, cx = x.shape
    xn = ln(x, g1, b1)
    qkv = xn @ wqkv                                              # (B, N, 3C)
    qkv = qkv.reshape(bx, nx, 3, NUM_HEADS, HEAD_DIM).transpose(2, 0, 3, 1, 4)
    q, k, v = qkv[0], qkv[1], qkv[2]                             # (B, H, N, Dh)
    attn = (q @ jnp.swapaxes(k, -2, -1)) * (HEAD_DIM ** -0.5)
    attn = jax.nn.softmax(attn, axis=-1)
    y = (attn @ v).transpose(0, 2, 1, 3).reshape(bx, nx, cx)
    y = y @ wproj + bproj
    x1 = x + y
    xn2 = ln(x1, g2, b2)
    h = jax.nn.gelu(xn2 @ w1 + bfc1, approximate=False)
    return x1 + (h @ w2 + bfc2)


def init_params(key):
    ks = jax.random.split(key, 8)
    std = 0.02
    g1 = 1.0 + 0.1 * jax.random.normal(ks[4], (1, C), jnp.float32)
    b1 = std * jax.random.normal(ks[5], (1, C), jnp.float32)
    wqkv = jax.random.normal(ks[0], (C, 3 * C), jnp.float32) * std   # qkv_bias=False
    wproj = jax.random.normal(ks[1], (C, C), jnp.float32) * std
    bproj = std * jax.random.normal(ks[6], (1, C), jnp.float32)
    g2 = 1.0 + 0.1 * jax.random.normal(ks[7], (1, C), jnp.float32)
    b2 = jnp.zeros((1, C), jnp.float32)
    w1 = jax.random.normal(ks[2], (C, HIDDEN), jnp.float32) * std
    bfc1 = jnp.zeros((1, HIDDEN), jnp.float32)
    w2 = jax.random.normal(ks[3], (HIDDEN, C), jnp.float32) * std
    bfc2 = jnp.zeros((1, C), jnp.float32)
    return (g1, b1, wqkv, wproj, bproj, g2, b2, w1, bfc1, w2, bfc2)


if __name__ == "__main__":
    key = jax.random.PRNGKey(0)
    kx, kp = jax.random.split(key)
    x = jax.random.normal(kx, (B, N, C), jnp.float32)
    params = init_params(kp)
    prepped = prepare_block_params(params)      # one-time prep (per layer, at init)

    out = jax.block_until_ready(vit_block(x, prepped))
    ref = jax.block_until_ready(reference_block(x, params))

    assert out.shape == (B, N, C)
    # bf16 MXU operands / bf16 weight storage and the approximate softmax
    # reciprocal perturb the result at the ~1e-3 level (inside 2e-2 here).
    err = float(jnp.max(jnp.abs(out - ref)))
    assert err < 2e-2, f"max err {err}"
    print("KERNEL_OK")
</pallas_src>

<mosaic_0001>
module attributes {stable_mosaic.version = 11 : i64} {
  func.func @block_kernel(%arg0: i32, %arg1: memref<1x16x128xf32, #tpu.memory_space<vmem>>, %arg2: memref<1x128xf32, #tpu.memory_space<vmem>>, %arg3: memref<1x128xf32, #tpu.memory_space<vmem>>, %arg4: memref<384x128xbf16, #tpu.memory_space<vmem>>, %arg5: memref<128x128xbf16, #tpu.memory_space<vmem>>, %arg6: memref<1x128xf32, #tpu.memory_space<vmem>>, %arg7: memref<1x128xf32, #tpu.memory_space<vmem>>, %arg8: memref<1x128xf32, #tpu.memory_space<vmem>>, %arg9: memref<128x512xbf16, #tpu.memory_space<vmem>>, %arg10: memref<1x512xf32, #tpu.memory_space<vmem>>, %arg11: memref<512x128xbf16, #tpu.memory_space<vmem>>, %arg12: memref<1x128xf32, #tpu.memory_space<vmem>>, %arg13: memref<1x16x128xf32, #tpu.memory_space<vmem>>, %arg14: memref<16x128xf32, #tpu.memory_space<vmem>>) attributes {dimension_semantics = [#tpu.dimension_semantics<parallel>], iteration_bounds = array<i64: 2>, scalar_prefetch = 0 : i64, scratch_operands = 1 : i64, tpu.core_type = #tpu.core_type<tc>, window_params = [{transform_indices = @transform_0, window_bounds = array<i64: 1, 16, 128>}, {pipeline_mode = #tpu.pipeline_mode<synchronous>, transform_indices = @transform_1, window_bounds = array<i64: 1, 128>}, {pipeline_mode = #tpu.pipeline_mode<synchronous>, transform_indices = @transform_2, window_bounds = array<i64: 1, 128>}, {pipeline_mode = #tpu.pipeline_mode<synchronous>, transform_indices = @transform_3, window_bounds = array<i64: 384, 128>}, {pipeline_mode = #tpu.pipeline_mode<synchronous>, transform_indices = @transform_4, window_bounds = array<i64: 128, 128>}, {pipeline_mode = #tpu.pipeline_mode<synchronous>, transform_indices = @transform_5, window_bounds = array<i64: 1, 128>}, {pipeline_mode = #tpu.pipeline_mode<synchronous>, transform_indices = @transform_6, window_bounds = array<i64: 1, 128>}, {pipeline_mode = #tpu.pipeline_mode<synchronous>, transform_indices = @transform_7, window_bounds = array<i64: 1, 128>}, {pipeline_mode = #tpu.pipeline_mode<synchronous>, transform_indices = @transform_8, window_bounds = array<i64: 128, 512>}, {pipeline_mode = #tpu.pipeline_mode<synchronous>, transform_indices = @transform_9, window_bounds = array<i64: 1, 512>}, {pipeline_mode = #tpu.pipeline_mode<synchronous>, transform_indices = @transform_10, window_bounds = array<i64: 512, 128>}, {pipeline_mode = #tpu.pipeline_mode<synchronous>, transform_indices = @transform_11, window_bounds = array<i64: 1, 128>}, {transform_indices = @transform_12, window_bounds = array<i64: 1, 16, 128>}]} {
    %c0 = arith.constant 0 : index
    %c0_0 = arith.constant 0 : index
    %c0_1 = arith.constant 0 : index
    %0 = vector.load %arg1[%c0, %c0_0, %c0_1] : memref<1x16x128xf32, #tpu.memory_space<vmem>>, vector<1x16x128xf32>
    %1 = vector.shape_cast %0 : vector<1x16x128xf32> to vector<16x128xf32>
    %c0_2 = arith.constant 0 : index
    %c0_3 = arith.constant 0 : index
    %2 = vector.load %arg2[%c0_2, %c0_3] : memref<1x128xf32, #tpu.memory_space<vmem>>, vector<1x128xf32>
    %c0_4 = arith.constant 0 : index
    %c0_5 = arith.constant 0 : index
    %3 = vector.load %arg3[%c0_4, %c0_5] : memref<1x128xf32, #tpu.memory_space<vmem>>, vector<1x128xf32>
    %cst = arith.constant dense<0.000000e+00> : vector<16xf32>
    %4 = vector.multi_reduction <add>, %1, %cst [1] : vector<16x128xf32> to vector<16xf32>
    %5 = vector.shape_cast %4 : vector<16xf32> to vector<16x1xf32>
    %cst_6 = arith.constant 1.280000e+02 : f32
    %6 = vector.broadcast %cst_6 : f32 to vector<16x1xf32>
    %7 = arith.divf %5, %6 : vector<16x1xf32>
    %8 = vector.broadcast %7 : vector<16x1xf32> to vector<16x128xf32>
    %9 = arith.subf %1, %8 : vector<16x128xf32>
    %10 = arith.mulf %9, %9 : vector<16x128xf32>
    %cst_7 = arith.constant dense<0.000000e+00> : vector<16xf32>
    %11 = vector.multi_reduction <add>, %10, %cst_7 [1] : vector<16x128xf32> to vector<16xf32>
    %12 = vector.shape_cast %11 : vector<16xf32> to vector<16x1xf32>
    %cst_8 = arith.constant 1.280000e+02 : f32
    %13 = vector.broadcast %cst_8 : f32 to vector<16x1xf32>
    %14 = arith.divf %12, %13 : vector<16x1xf32>
    %15 = vector.broadcast %7 : vector<16x1xf32> to vector<16x128xf32>
    %16 = arith.subf %1, %15 : vector<16x128xf32>
    %cst_9 = arith.constant 9.99999974E-6 : f32
    %17 = vector.broadcast %cst_9 : f32 to vector<16x1xf32>
    %18 = arith.addf %14, %17 : vector<16x1xf32>
    %19 = math.rsqrt %18 : vector<16x1xf32>
    %20 = vector.broadcast %19 : vector<16x1xf32> to vector<16x128xf32>
    %21 = arith.mulf %16, %20 : vector<16x128xf32>
    %22 = vector.broadcast %2 : vector<1x128xf32> to vector<16x128xf32>
    %23 = arith.mulf %21, %22 : vector<16x128xf32>
    %24 = vector.broadcast %3 : vector<1x128xf32> to vector<16x128xf32>
    %25 = arith.addf %23, %24 : vector<16x128xf32>
    %c0_10 = arith.constant 0 : index
    %c0_11 = arith.constant 0 : index
    %26 = vector.load %arg4[%c0_10, %c0_11] : memref<384x128xbf16, #tpu.memory_space<vmem>>, vector<384x128xbf16>
    %27 = arith.truncf %25 : vector<16x128xf32> to vector<16x128xbf16>
    %cst_12 = arith.constant dense<0.000000e+00> : vector<384x16xf32>
    %28 = tpu.matmul %26, %27, %cst_12 {dimension_numbers = #tpu.dot_dimension_numbers<[1], [1], [0], [0], [0, 0, 1, 0], [], []>} : vector<384x128xbf16>, vector<16x128xbf16>, vector<384x16xf32> -> vector<384x16xf32>
    %29 = vector.extract_strided_slice %28 {offsets = [0, 0], sizes = [32, 16], strides = [1, 1]} : vector<384x16xf32> to vector<32x16xf32>
    %30 = vector.extract_strided_slice %28 {offsets = [128, 0], sizes = [32, 16], strides = [1, 1]} : vector<384x16xf32> to vector<32x16xf32>
    %31 = vector.extract_strided_slice %28 {offsets = [256, 0], sizes = [32, 16], strides = [1, 1]} : vector<384x16xf32> to vector<32x16xf32>
    %32 = arith.truncf %29 : vector<32x16xf32> to vector<32x16xbf16>
    %33 = arith.truncf %30 : vector<32x16xf32> to vector<32x16xbf16>
    %cst_13 = arith.constant dense<0.000000e+00> : vector<16x16xf32>
    %34 = tpu.matmul %32, %33, %cst_13 {dimension_numbers = #tpu.dot_dimension_numbers<[0], [0], [1], [1], [0, 1, 1, 1], [], []>} : vector<32x16xbf16>, vector<32x16xbf16>, vector<16x16xf32> -> vector<16x16xf32>
    %cst_14 = arith.constant dense<0xFF800000> : vector<16xf32>
    %35 = vector.multi_reduction <maximumf>, %34, %cst_14 [1] : vector<16x16xf32> to vector<16xf32>
    %36 = vector.shape_cast %35 : vector<16xf32> to vector<16x1xf32>
    %37 = vector.broadcast %36 : vector<16x1xf32> to vector<16x16xf32>
    %38 = arith.subf %34, %37 : vector<16x16xf32>
    %39 = math.exp %38 : vector<16x16xf32>
    %cst_15 = arith.constant dense<0.000000e+00> : vector<16xf32>
    %40 = vector.multi_reduction <add>, %39, %cst_15 [1] : vector<16x16xf32> to vector<16xf32>
    %41 = vector.shape_cast %40 : vector<16xf32> to vector<16x1xf32>
    %42 = tpu.reciprocal %41 {approx = true} : vector<16x1xf32> -> vector<16x1xf32>
    %43 = vector.broadcast %42 : vector<16x1xf32> to vector<16x16xf32>
    %44 = arith.mulf %39, %43 : vector<16x16xf32>
    %45 = arith.truncf %44 : vector<16x16xf32> to vector<16x16xbf16>
    %46 = arith.truncf %31 : vector<32x16xf32> to vector<32x16xbf16>
    %cst_16 = arith.constant dense<0.000000e+00> : vector<16x32xf32>
    %47 = tpu.matmul %45, %46, %cst_16 {dimension_numbers = #tpu.dot_dimension_numbers<[1], [1], [0], [0], [0, 0, 1, 0], [], []>} : vector<16x16xbf16>, vector<32x16xbf16>, vector<16x32xf32> -> vector<16x32xf32>
    %c0_17 = arith.constant 0 : index
    %c0_18 = arith.constant 0 : index
    %48 = vector.load %arg14[%c0_17, %c0_18] : memref<16x128xf32, #tpu.memory_space<vmem>>, vector<16x32xf32>
    tpu.vector_store %arg14[%c0_17, %c0_18], %47 {strides = array<i32>} : memref<16x128xf32, #tpu.memory_space<vmem>>, vector<16x32xf32>,
    %49 = vector.extract_strided_slice %28 {offsets = [32, 0], sizes = [32, 16], strides = [1, 1]} : vector<384x16xf32> to vector<32x16xf32>
    %50 = vector.extract_strided_slice %28 {offsets = [160, 0], sizes = [32, 16], strides = [1, 1]} : vector<384x16xf32> to vector<32x16xf32>
    %51 = vector.extract_strided_slice %28 {offsets = [288, 0], sizes = [32, 16], strides = [1, 1]} : vector<384x16xf32> to vector<32x16xf32>
    %52 = arith.truncf %49 : vector<32x16xf32> to vector<32x16xbf16>
    %53 = arith.truncf %50 : vector<32x16xf32> to vector<32x16xbf16>
    %cst_19 = arith.constant dense<0.000000e+00> : vector<16x16xf32>
    %54 = tpu.matmul %52, %53, %cst_19 {dimension_numbers = #tpu.dot_dimension_numbers<[0], [0], [1], [1], [0, 1, 1, 1], [], []>} : vector<32x16xbf16>, vector<32x16xbf16>, vector<16x16xf32> -> vector<16x16xf32>
    %cst_20 = arith.constant dense<0xFF800000> : vector<16xf32>
    %55 = vector.multi_reduction <maximumf>, %54, %cst_20 [1] : vector<16x16xf32> to vector<16xf32>
    %56 = vector.shape_cast %55 : vector<16xf32> to vector<16x1xf32>
    %57 = vector.broadcast %56 : vector<16x1xf32> to vector<16x16xf32>
    %58 = arith.subf %54, %57 : vector<16x16xf32>
    %59 = math.exp %58 : vector<16x16xf32>
    %cst_21 = arith.constant dense<0.000000e+00> : vector<16xf32>
    %60 = vector.multi_reduction <add>, %59, %cst_21 [1] : vector<16x16xf32> to vector<16xf32>
    %61 = vector.shape_cast %60 : vector<16xf32> to vector<16x1xf32>
    %62 = tpu.reciprocal %61 {approx = true} : vector<16x1xf32> -> vector<16x1xf32>
    %63 = vector.broadcast %62 : vector<16x1xf32> to vector<16x16xf32>
    %64 = arith.mulf %59, %63 : vector<16x16xf32>
    %65 = arith.truncf %64 : vector<16x16xf32> to vector<16x16xbf16>
    %66 = arith.truncf %51 : vector<32x16xf32> to vector<32x16xbf16>
    %cst_22 = arith.constant dense<0.000000e+00> : vector<16x32xf32>
    %67 = tpu.matmul %65, %66, %cst_22 {dimension_numbers = #tpu.dot_dimension_numbers<[1], [1], [0], [0], [0, 0, 1, 0], [], []>} : vector<16x16xbf16>, vector<32x16xbf16>, vector<16x32xf32> -> vector<16x32xf32>
    %c0_23 = arith.constant 0 : index
    %c32 = arith.constant 32 : index
    %68 = vector.load %arg14[%c0_23, %c32] : memref<16x128xf32, #tpu.memory_space<vmem>>, vector<16x32xf32>
    tpu.vector_store %arg14[%c0_23, %c32], %67 {strides = array<i32>} : memref<16x128xf32, #tpu.memory_space<vmem>>, vector<16x32xf32>,
    %69 = vector.extract_strided_slice %28 {offsets = [64, 0], sizes = [32, 16], strides = [1, 1]} : vector<384x16xf32> to vector<32x16xf32>
    %70 = vector.extract_strided_slice %28 {offsets = [192, 0], sizes = [32, 16], strides = [1, 1]} : vector<384x16xf32> to vector<32x16xf32>
    %71 = vector.extract_strided_slice %28 {offsets = [320, 0], sizes = [32, 16], strides = [1, 1]} : vector<384x16xf32> to vector<32x16xf32>
    %72 = arith.truncf %69 : vector<32x16xf32> to vector<32x16xbf16>
    %73 = arith.truncf %70 : vector<32x16xf32> to vector<32x16xbf16>
    %cst_24 = arith.constant dense<0.000000e+00> : vector<16x16xf32>
    %74 = tpu.matmul %72, %73, %cst_24 {dimension_numbers = #tpu.dot_dimension_numbers<[0], [0], [1], [1], [0, 1, 1, 1], [], []>} : vector<32x16xbf16>, vector<32x16xbf16>, vector<16x16xf32> -> vector<16x16xf32>
    %cst_25 = arith.constant dense<0xFF800000> : vector<16xf32>
    %75 = vector.multi_reduction <maximumf>, %74, %cst_25 [1] : vector<16x16xf32> to vector<16xf32>
    %76 = vector.shape_cast %75 : vector<16xf32> to vector<16x1xf32>
    %77 = vector.broadcast %76 : vector<16x1xf32> to vector<16x16xf32>
    %78 = arith.subf %74, %77 : vector<16x16xf32>
    %79 = math.exp %78 : vector<16x16xf32>
    %cst_26 = arith.constant dense<0.000000e+00> : vector<16xf32>
    %80 = vector.multi_reduction <add>, %79, %cst_26 [1] : vector<16x16xf32> to vector<16xf32>
    %81 = vector.shape_cast %80 : vector<16xf32> to vector<16x1xf32>
    %82 = tpu.reciprocal %81 {approx = true} : vector<16x1xf32> -> vector<16x1xf32>
    %83 = vector.broadcast %82 : vector<16x1xf32> to vector<16x16xf32>
    %84 = arith.mulf %79, %83 : vector<16x16xf32>
    %85 = arith.truncf %84 : vector<16x16xf32> to vector<16x16xbf16>
    %86 = arith.truncf %71 : vector<32x16xf32> to vector<32x16xbf16>
    %cst_27 = arith.constant dense<0.000000e+00> : vector<16x32xf32>
    %87 = tpu.matmul %85, %86, %cst_27 {dimension_numbers = #tpu.dot_dimension_numbers<[1], [1], [0], [0], [0, 0, 1, 0], [], []>} : vector<16x16xbf16>, vector<32x16xbf16>, vector<16x32xf32> -> vector<16x32xf32>
    %c0_28 = arith.constant 0 : index
    %c64 = arith.constant 64 : index
    %88 = vector.load %arg14[%c0_28, %c64] : memref<16x128xf32, #tpu.memory_space<vmem>>, vector<16x32xf32>
    tpu.vector_store %arg14[%c0_28, %c64], %87 {strides = array<i32>} : memref<16x128xf32, #tpu.memory_space<vmem>>, vector<16x32xf32>,
    %89 = vector.extract_strided_slice %28 {offsets = [96, 0], sizes = [32, 16], strides = [1, 1]} : vector<384x16xf32> to vector<32x16xf32>
    %90 = vector.extract_strided_slice %28 {offsets = [224, 0], sizes = [32, 16], strides = [1, 1]} : vector<384x16xf32> to vector<32x16xf32>
    %91 = vector.extract_strided_slice %28 {offsets = [352, 0], sizes = [32, 16], strides = [1, 1]} : vector<384x16xf32> to vector<32x16xf32>
    %92 = arith.truncf %89 : vector<32x16xf32> to vector<32x16xbf16>
    %93 = arith.truncf %90 : vector<32x16xf32> to vector<32x16xbf16>
    %cst_29 = arith.constant dense<0.000000e+00> : vector<16x16xf32>
    %94 = tpu.matmul %92, %93, %cst_29 {dimension_numbers = #tpu.dot_dimension_numbers<[0], [0], [1], [1], [0, 1, 1, 1], [], []>} : vector<32x16xbf16>, vector<32x16xbf16>, vector<16x16xf32> -> vector<16x16xf32>
    %cst_30 = arith.constant dense<0xFF800000> : vector<16xf32>
    %95 = vector.multi_reduction <maximumf>, %94, %cst_30 [1] : vector<16x16xf32> to vector<16xf32>
    %96 = vector.shape_cast %95 : vector<16xf32> to vector<16x1xf32>
    %97 = vector.broadcast %96 : vector<16x1xf32> to vector<16x16xf32>
    %98 = arith.subf %94, %97 : vector<16x16xf32>
    %99 = math.exp %98 : vector<16x16xf32>
    %cst_31 = arith.constant dense<0.000000e+00> : vector<16xf32>
    %100 = vector.multi_reduction <add>, %99, %cst_31 [1] : vector<16x16xf32> to vector<16xf32>
    %101 = vector.shape_cast %100 : vector<16xf32> to vector<16x1xf32>
    %102 = tpu.reciprocal %101 {approx = true} : vector<16x1xf32> -> vector<16x1xf32>
    %103 = vector.broadcast %102 : vector<16x1xf32> to vector<16x16xf32>
    %104 = arith.mulf %99, %103 : vector<16x16xf32>
    %105 = arith.truncf %104 : vector<16x16xf32> to vector<16x16xbf16>
    %106 = arith.truncf %91 : vector<32x16xf32> to vector<32x16xbf16>
    %cst_32 = arith.constant dense<0.000000e+00> : vector<16x32xf32>
    %107 = tpu.matmul %105, %106, %cst_32 {dimension_numbers = #tpu.dot_dimension_numbers<[1], [1], [0], [0], [0, 0, 1, 0], [], []>} : vector<16x16xbf16>, vector<32x16xbf16>, vector<16x32xf32> -> vector<16x32xf32>
    %c0_33 = arith.constant 0 : index
    %c96 = arith.constant 96 : index
    %108 = vector.load %arg14[%c0_33, %c96] : memref<16x128xf32, #tpu.memory_space<vmem>>, vector<16x32xf32>
    tpu.vector_store %arg14[%c0_33, %c96], %107 {strides = array<i32>} : memref<16x128xf32, #tpu.memory_space<vmem>>, vector<16x32xf32>,
    %c0_34 = arith.constant 0 : index
    %c0_35 = arith.constant 0 : index
    %109 = vector.load %arg14[%c0_34, %c0_35] : memref<16x128xf32, #tpu.memory_space<vmem>>, vector<16x128xf32>
    %110 = arith.truncf %109 : vector<16x128xf32> to vector<16x128xbf16>
    %c0_36 = arith.constant 0 : index
    %c0_37 = arith.constant 0 : index
    %111 = vector.load %arg5[%c0_36, %c0_37] : memref<128x128xbf16, #tpu.memory_space<vmem>>, vector<128x128xbf16>
    %cst_38 = arith.constant dense<0.000000e+00> : vector<16x128xf32>
    %112 = tpu.matmul %110, %111, %cst_38 {dimension_numbers = #tpu.dot_dimension_numbers<[1], [0], [0], [1], [0, 0, 1, 1], [], []>} : vector<16x128xbf16>, vector<128x128xbf16>, vector<16x128xf32> -> vector<16x128xf32>
    %c0_39 = arith.constant 0 : index
    %c0_40 = arith.constant 0 : index
    %113 = vector.load %arg6[%c0_39, %c0_40] : memref<1x128xf32, #tpu.memory_space<vmem>>, vector<1x128xf32>
    %114 = vector.broadcast %113 : vector<1x128xf32> to vector<16x128xf32>
    %115 = arith.addf %112, %114 : vector<16x128xf32>
    %116 = arith.addf %1, %115 : vector<16x128xf32>
    %c0_41 = arith.constant 0 : index
    %c0_42 = arith.constant 0 : index
    %117 = vector.load %arg7[%c0_41, %c0_42] : memref<1x128xf32, #tpu.memory_space<vmem>>, vector<1x128xf32>
    %c0_43 = arith.constant 0 : index
    %c0_44 = arith.constant 0 : index
    %118 = vector.load %arg8[%c0_43, %c0_44] : memref<1x128xf32, #tpu.memory_space<vmem>>, vector<1x128xf32>
    %cst_45 = arith.constant dense<0.000000e+00> : vector<16xf32>
    %119 = vector.multi_reduction <add>, %116, %cst_45 [1] : vector<16x128xf32> to vector<16xf32>
    %120 = vector.shape_cast %119 : vector<16xf32> to vector<16x1xf32>
    %cst_46 = arith.constant 1.280000e+02 : f32
    %121 = vector.broadcast %cst_46 : f32 to vector<16x1xf32>
    %122 = arith.divf %120, %121 : vector<16x1xf32>
    %123 = vector.broadcast %122 : vector<16x1xf32> to vector<16x128xf32>
    %124 = arith.subf %116, %123 : vector<16x128xf32>
    %125 = arith.mulf %124, %124 : vector<16x128xf32>
    %cst_47 = arith.constant dense<0.000000e+00> : vector<16xf32>
    %126 = vector.multi_reduction <add>, %125, %cst_47 [1] : vector<16x128xf32> to vector<16xf32>
    %127 = vector.shape_cast %126 : vector<16xf32> to vector<16x1xf32>
    %cst_48 = arith.constant 1.280000e+02 : f32
    %128 = vector.broadcast %cst_48 : f32 to vector<16x1xf32>
    %129 = arith.divf %127, %128 : vector<16x1xf32>
    %130 = vector.broadcast %122 : vector<16x1xf32> to vector<16x128xf32>
    %131 = arith.subf %116, %130 : vector<16x128xf32>
    %cst_49 = arith.constant 9.99999974E-6 : f32
    %132 = vector.broadcast %cst_49 : f32 to vector<16x1xf32>
    %133 = arith.addf %129, %132 : vector<16x1xf32>
    %134 = math.rsqrt %133 : vector<16x1xf32>
    %135 = vector.broadcast %134 : vector<16x1xf32> to vector<16x128xf32>
    %136 = arith.mulf %131, %135 : vector<16x128xf32>
    %137 = vector.broadcast %117 : vector<1x128xf32> to vector<16x128xf32>
    %138 = arith.mulf %136, %137 : vector<16x128xf32>
    %139 = vector.broadcast %118 : vector<1x128xf32> to vector<16x128xf32>
    %140 = arith.addf %138, %139 : vector<16x128xf32>
    %141 = arith.truncf %140 : vector<16x128xf32> to vector<16x128xbf16>
    %c0_50 = arith.constant 0 : index
    %c0_51 = arith.constant 0 : index
    %142 = vector.load %arg9[%c0_50, %c0_51] : memref<128x512xbf16, #tpu.memory_space<vmem>>, vector<128x512xbf16>
    %cst_52 = arith.constant dense<0.000000e+00> : vector<16x512xf32>
    %143 = tpu.matmul %141, %142, %cst_52 {dimension_numbers = #tpu.dot_dimension_numbers<[1], [0], [0], [1], [0, 0, 1, 1], [], []>} : vector<16x128xbf16>, vector<128x512xbf16>, vector<16x512xf32> -> vector<16x512xf32>
    %c0_53 = arith.constant 0 : index
    %c0_54 = arith.constant 0 : index
    %144 = vector.load %arg10[%c0_53, %c0_54] : memref<1x512xf32, #tpu.memory_space<vmem>>, vector<1x512xf32>
    %145 = vector.broadcast %144 : vector<1x512xf32> to vector<16x512xf32>
    %146 = arith.addf %143, %145 : vector<16x512xf32>
    %cst_55 = arith.constant 5.000000e-01 : f32
    %147 = vector.broadcast %cst_55 : f32 to vector<16x512xf32>
    %148 = arith.mulf %147, %146 : vector<16x512xf32>
    %cst_56 = arith.constant 0.707106769 : f32
    %149 = vector.broadcast %cst_56 : f32 to vector<16x512xf32>
    %150 = arith.mulf %146, %149 : vector<16x512xf32>
    %cst_57 = arith.constant 0.000000e+00 : f32
    %151 = vector.broadcast %cst_57 : f32 to vector<16x512xf32>
    %152 = arith.cmpf oge, %150, %151 : vector<16x512xf32>
    %cst_58 = arith.constant 1.000000e+00 : f32
    %cst_59 = arith.constant -1.000000e+00 : f32
    %153 = vector.broadcast %cst_58 : f32 to vector<16x512xf32>
    %154 = vector.broadcast %cst_59 : f32 to vector<16x512xf32>
    %155 = arith.select %152, %153, %154 : vector<16x512xi1>, vector<16x512xf32>
    %156 = math.absf %150 : vector<16x512xf32>
    %cst_60 = arith.constant 0.327591091 : f32
    %157 = vector.broadcast %cst_60 : f32 to vector<16x512xf32>
    %158 = arith.mulf %157, %156 : vector<16x512xf32>
    %cst_61 = arith.constant 1.000000e+00 : f32
    %159 = vector.broadcast %cst_61 : f32 to vector<16x512xf32>
    %160 = arith.addf %159, %158 : vector<16x512xf32>
    %cst_62 = arith.constant 1.000000e+00 : f32
    %161 = vector.broadcast %cst_62 : f32 to vector<16x512xf32>
    %162 = arith.divf %161, %160 : vector<16x512xf32>
    %cst_63 = arith.constant 1.06140542 : f32
    %163 = vector.broadcast %cst_63 : f32 to vector<16x512xf32>
    %164 = arith.mulf %163, %162 : vector<16x512xf32>
    %cst_64 = arith.constant -1.45315206 : f32
    %165 = vector.broadcast %cst_64 : f32 to vector<16x512xf32>
    %166 = arith.addf %164, %165 : vector<16x512xf32>
    %167 = arith.mulf %166, %162 : vector<16x512xf32>
    %cst_65 = arith.constant 1.42141378 : f32
    %168 = vector.broadcast %cst_65 : f32 to vector<16x512xf32>
    %169 = arith.addf %167, %168 : vector<16x512xf32>
    %170 = arith.mulf %169, %162 : vector<16x512xf32>
    %cst_66 = arith.constant -0.284496725 : f32
    %171 = vector.broadcast %cst_66 : f32 to vector<16x512xf32>
    %172 = arith.addf %170, %171 : vector<16x512xf32>
    %173 = arith.mulf %172, %162 : vector<16x512xf32>
    %cst_67 = arith.constant 0.254829586 : f32
    %174 = vector.broadcast %cst_67 : f32 to vector<16x512xf32>
    %175 = arith.addf %173, %174 : vector<16x512xf32>
    %176 = arith.mulf %175, %162 : vector<16x512xf32>
    %cst_68 = arith.constant 0.000000e+00 : f32
    %177 = vector.broadcast %cst_68 : f32 to vector<16x512xf32>
    %178 = arith.subf %177, %156 : vector<16x512xf32>
    %179 = arith.mulf %178, %156 : vector<16x512xf32>
    %180 = math.exp %179 : vector<16x512xf32>
    %181 = arith.mulf %176, %180 : vector<16x512xf32>
    %cst_69 = arith.constant 1.000000e+00 : f32
    %182 = vector.broadcast %cst_69 : f32 to vector<16x512xf32>
    %183 = arith.subf %182, %181 : vector<16x512xf32>
    %184 = arith.mulf %155, %183 : vector<16x512xf32>
    %cst_70 = arith.constant 1.000000e+00 : f32
    %185 = vector.broadcast %cst_70 : f32 to vector<16x512xf32>
    %186 = arith.addf %185, %184 : vector<16x512xf32>
    %187 = arith.mulf %148, %186 : vector<16x512xf32>
    %188 = arith.truncf %187 : vector<16x512xf32> to vector<16x512xbf16>
    %c0_71 = arith.constant 0 : index
    %c0_72 = arith.constant 0 : index
    %189 = vector.load %arg11[%c0_71, %c0_72] : memref<512x128xbf16, #tpu.memory_space<vmem>>, vector<512x128xbf16>
    %cst_73 = arith.constant dense<0.000000e+00> : vector<16x128xf32>
    %190 = tpu.matmul %188, %189, %cst_73 {dimension_numbers = #tpu.dot_dimension_numbers<[1], [0], [0], [1], [0, 0, 1, 1], [], []>} : vector<16x512xbf16>, vector<512x128xbf16>, vector<16x128xf32> -> vector<16x128xf32>
    %c0_74 = arith.constant 0 : index
    %c0_75 = arith.constant 0 : index
    %191 = vector.load %arg12[%c0_74, %c0_75] : memref<1x128xf32, #tpu.memory_space<vmem>>, vector<1x128xf32>
    %192 = vector.broadcast %191 : vector<1x128xf32> to vector<16x128xf32>
    %193 = arith.addf %190, %192 : vector<16x128xf32>
    %194 = arith.addf %116, %193 : vector<16x128xf32>
    %c0_76 = arith.constant 0 : index
    %c0_77 = arith.constant 0 : index
    %c0_78 = arith.constant 0 : index
    %195 = vector.load %arg13[%c0_76, %c0_77, %c0_78] : memref<1x16x128xf32, #tpu.memory_space<vmem>>, vector<1x16x128xf32>
    %196 = vector.shape_cast %195 : vector<1x16x128xf32> to vector<16x128xf32>
    %197 = vector.shape_cast %194 : vector<16x128xf32> to vector<1x16x128xf32>
    tpu.vector_store %arg13[%c0_76, %c0_77, %c0_78], %197 {strides = array<i32>} : memref<1x16x128xf32, #tpu.memory_space<vmem>>, vector<1x16x128xf32>,
    return
  }
  func.func @transform_0(%arg0: i32) -> (i32, i32, i32) {
    %c0_i32 = arith.constant 0 : i32
    %c0_i32_0 = arith.constant 0 : i32
    %c0_i32_1 = arith.constant 0 : i32
    return %arg0, %c0_i32, %c0_i32_0 : i32, i32, i32
  }
  func.func @transform_1(%arg0: i32) -> (i32, i32) {
    %c0_i32 = arith.constant 0 : i32
    %c0_i32_0 = arith.constant 0 : i32
    %c0_i32_1 = arith.constant 0 : i32
    return %c0_i32, %c0_i32_0 : i32, i32
  }
  func.func @transform_2(%arg0: i32) -> (i32, i32) {
    %c0_i32 = arith.constant 0 : i32
    %c0_i32_0 = arith.constant 0 : i32
    %c0_i32_1 = arith.constant 0 : i32
    return %c0_i32, %c0_i32_0 : i32, i32
  }
  func.func @transform_3(%arg0: i32) -> (i32, i32) {
    %c0_i32 = arith.constant 0 : i32
    %c0_i32_0 = arith.constant 0 : i32
    %c0_i32_1 = arith.constant 0 : i32
    return %c0_i32, %c0_i32_0 : i32, i32
  }
  func.func @transform_4(%arg0: i32) -> (i32, i32) {
    %c0_i32 = arith.constant 0 : i32
    %c0_i32_0 = arith.constant 0 : i32
    %c0_i32_1 = arith.constant 0 : i32
    return %c0_i32, %c0_i32_0 : i32, i32
  }
  func.func @transform_5(%arg0: i32) -> (i32, i32) {
    %c0_i32 = arith.constant 0 : i32
    %c0_i32_0 = arith.constant 0 : i32
    %c0_i32_1 = arith.constant 0 : i32
    return %c0_i32, %c0_i32_0 : i32, i32
  }
  func.func @transform_6(%arg0: i32) -> (i32, i32) {
    %c0_i32 = arith.constant 0 : i32
    %c0_i32_0 = arith.constant 0 : i32
    %c0_i32_1 = arith.constant 0 : i32
    return %c0_i32, %c0_i32_0 : i32, i32
  }
  func.func @transform_7(%arg0: i32) -> (i32, i32) {
    %c0_i32 = arith.constant 0 : i32
    %c0_i32_0 = arith.constant 0 : i32
    %c0_i32_1 = arith.constant 0 : i32
    return %c0_i32, %c0_i32_0 : i32, i32
  }
  func.func @transform_8(%arg0: i32) -> (i32, i32) {
    %c0_i32 = arith.constant 0 : i32
    %c0_i32_0 = arith.constant 0 : i32
    %c0_i32_1 = arith.constant 0 : i32
    return %c0_i32, %c0_i32_0 : i32, i32
  }
  func.func @transform_9(%arg0: i32) -> (i32, i32) {
    %c0_i32 = arith.constant 0 : i32
    %c0_i32_0 = arith.constant 0 : i32
    %c0_i32_1 = arith.constant 0 : i32
    return %c0_i32, %c0_i32_0 : i32, i32
  }
  func.func @transform_10(%arg0: i32) -> (i32, i32) {
    %c0_i32 = arith.constant 0 : i32
    %c0_i32_0 = arith.constant 0 : i32
    %c0_i32_1 = arith.constant 0 : i32
    return %c0_i32, %c0_i32_0 : i32, i32
  }
  func.func @transform_11(%arg0: i32) -> (i32, i32) {
    %c0_i32 = arith.constant 0 : i32
    %c0_i32_0 = arith.constant 0 : i32
    %c0_i32_1 = arith.constant 0 : i32
    return %c0_i32, %c0_i32_0 : i32, i32
  }
  func.func @transform_12(%arg0: i32) -> (i32, i32, i32) {
    %c0_i32 = arith.constant 0 : i32
    %c0_i32_0 = arith.constant 0 : i32
    %c0_i32_1 = arith.constant 0 : i32
    return %arg0, %c0_i32, %c0_i32_0 : i32, i32, i32
  }
}

</mosaic_0001>

<bundles_post_ra>
// kernel: vit_block.1
= control target key start
LH: loop header
LB: loop body
LE: loop exit
PB: predicated region body
PF: predicated region fallthrough
CT: control target
= control target key end

     0   :  { %s4226_s0 = inlined_call_operand.hbm [shape: f32[2,16,128], index: 0, kind: input, shape index: {}]   ;;  %s4227_s1 = inlined_call_operand.vmem [shape: f32[1,128], index: 1, kind: input, shape index: {}]   ;;  %s4228_s2 = inlined_call_operand.vmem [shape: f32[1,128], index: 2, kind: input, shape index: {}]   ;;  %s4229_s3 = inlined_call_operand.hbm [shape: bf16[384,128], index: 3, kind: input, shape index: {}]   ;;  %s4230_s4 = inlined_call_operand.hbm [shape: bf16[128,128], index: 4, kind: input, shape index: {}]   ;;  %s4231_s5 = inlined_call_operand.vmem [shape: f32[1,128], index: 5, kind: input, shape index: {}]   ;;  %s4232_s6 = inlined_call_operand.vmem [shape: f32[1,128], index: 6, kind: input, shape index: {}]   ;;  %s4233_s7 = inlined_call_operand.vmem [shape: f32[1,128], index: 7, kind: input, shape index: {}]   ;;  %s4234_s8 = inlined_call_operand.hbm [shape: bf16[128,512], index: 8, kind: input, shape index: {}]   ;;  %s4235_s9 = inlined_call_operand.vmem [shape: f32[1,512], index: 9, kind: input, shape index: {}]   ;;  %s4236_s10 = inlined_call_operand.hbm [shape: bf16[512,128], index: 10, kind: input, shape index: {}]   ;;  %s4237_s11 = inlined_call_operand.vmem [shape: f32[1,128], index: 11, kind: input, shape index: {}]   ;;  %s4238_s12 = inlined_call_operand.hbm [shape: f32[2,16,128], index: 12, kind: output, shape index: {}]  }
   0x1   :  { %4249 = sst [smem:[#allocation19_spill]] %s4229_s3 }
   0x2   :  { %4250 = sst [smem:[#allocation20_spill]] %s4230_s4 }
   0x3   :  { %4251 = sst [smem:[#allocation21_spill]] %s4234_s8 }
   0x4   :  { %4252 = sst [smem:[#allocation22_spill]] %s4236_s10 }
   0x5   :  { %17 = vsyncpa [#allocation4], 0 }
   0x6   :  { %19 = vsyncpa [#allocation4 + $0x1], 0 }
   0x7   :  { %20 = vsyncpa [#allocation7], 0 }
   0x8   :  { %21 = vsyncpa [#allocation10], 0 }
   0x9   :  { %22 = vsyncpa [#allocation5], 0 }
   0xa   :  { %24 = vsyncpa [#allocation5 + $0x1], 0  ;;  %s3647_s21 = smov 0   ;;  %s3649_s22 = smov 0  }
   0xb   :  { %s3651_s23 = smov 0   ;;  %s3653_s24 = smov 0  }
   0xc LB: > { %4253 = sst [smem:[#allocation17_spill]] %s3547_s21  ;;  %s3668_s25 = sadd.s32 4294967295, %s3559_s24   ;;  %s3559_s24 = sphi %s3653_s24, %s4282_s24   ;;  %s3555_s23 = sphi %s3651_s23, %s4281_s23   ;;  %s3551_s22 = sphi %s3649_s22, %s4280_s22   ;;  %s3547_s21 = sphi %s3647_s21, %s4279_s21  }
   0xd   : > { %s2697_s26 = sadd.s32 4294967294, %s3559_s24   ;;  %p50_p0 = scmp.ne.s32.totalorder %s3551_s22, %s3547_s21 }
   0xe   : > { %p4245_p1 = scmp.eq.s32.totalorder %s3668_s25, 0  ;;  %p311_p3 = scmp.eq.s32.totalorder %s2697_s26, 1 }
   0xf   : > { %p2698_p5 = scmp.ge.s32.totalorder %s3559_s24, 1  ;;  %p318_p7 = scmp.lt.s32.totalorder %s3559_s24, 3 }
  0x10   : > { %p3677_p4 = por %p4245_p1, %p50_p0  ;;  %p3682_p6 = por %p311_p3, %p50_p0 }
  0x11   : > { %p3687_p8 = pnand %p2698_p5, %p318_p7  ;;  %s3561_s30 = smov [#allocation6]  }
  0x12   : > { %s4254_s27 = scalar_select %p3677_p4, 1, 0 }
  0x13   : > { %s4255_s28 = scalar_select %p3682_p6, 1, 0 }
  0x14   : > { %s4257_s29 = scalar_select %p3687_p8, 1, 0 }
  0x15   : > { %4256 = sst [smem:[#allocation18_spill]] %s4255_s28  ;;  %s336_s13 = sshll.u32 %s3561_s30, 4  ;;  %s337_s13 = int_to_ptr.vmem [resolvable:$true] %s336_s13 }
  0x16   : > { %p3087_p9 = pneg %p3687_p8  ;;  %s3562_s15 = smov [#allocation9]  }
  0x17   : > { %s371_s16 = sshll.u32 %s3562_s15, 4  ;;  %s3366_s17 = scalar_lea.vmem %s337_s13, 3072  ;;  %s372_s16 = int_to_ptr.vmem [resolvable:$true] %s371_s16 }
  0x18   : > { %p3696_p11 = pnand %p3087_p9, %p4245_p1  ;;  %p3367_p13 = scmp.ne.s32.totalorder %s337_s13, %s3366_s17 }
  0x19   : > { %p3374_p5 = scmp.lt.s32.totalorder %s337_s13, %s337_s13  ;;  %p3375_p7 = scmp.lt.s32.totalorder %s3366_s17, %s3366_s17 }
  0x1a   : > { %p3357_p12 = pneg %p3696_p11 }
  0x1b   : > { %p3376_p10 = por %p3375_p7, %p3374_p5 }
  0x1c   : > { %p3369_p0 = pnand %p3367_p13, %p3357_p12 }
  0x1e   : > { %p3370_p3 = pneg %p3369_p0 }
  0x20   : > { %p3377_p9 = pnand %p3376_p10, %p3370_p3 }
  0x22   : > { %3380 = shalt.err (!%p3377_p9)
}
  0x23   : > { %s4241_s18 = smov 64   ;;  %s4243_s19 = smov 4  }
  0x24   : > { %s4259_s3 = sld [smem:[#allocation19_spill]]  ;;  %s3392_s30 = scalar_lea.vmem %s372_s16, 4096 }
  0x25   : > { %p3393_p13 = scmp.ne.s32.totalorder %s372_s16, %s3392_s30  ;;  %p3400_p10 = scmp.lt.s32.totalorder %s372_s16, %s372_s16 }
  0x26   : > { %p3401_p3 = scmp.lt.s32.totalorder %s3392_s30, %s3392_s30 }
  0x27   : > { %p3395_p0 = pnand %p3393_p13, %p3357_p12 }
  0x28   : > { %p3402_p7 = por %p3401_p3, %p3400_p10 }
  0x29   : > { %p3396_p5 = pneg %p3395_p0 }
  0x2a   : > { %3090 = dma.hbm_to_vmem [thread:$0]  (!%p3696_p11), %s4259_s3, 3072, %s337_s13, [#allocation7], %s4241_s18, %s4241_s18, %s4243_s19  }
  0x2b   : > { %p3403_p9 = pnand %p3402_p7, %p3396_p5 }
  0x2d   : > { %3406 = shalt.err (!%p3403_p9)
}
  0x2e   : > { %s3565_s15 = smov 256   ;;  %s3566_s17 = smov 16  }
  0x2f   : > { %s4260_s8 = sld [smem:[#allocation21_spill]]  ;;  %s3567_s13 = smov [#allocation8]  }
  0x30   : > { %s349_s20 = sshll.u32 %s3567_s13, 4  ;;  %s3568_s26 = smov [#allocation11]   ;;  %s350_s20 = int_to_ptr.vmem [resolvable:$true] %s349_s20 }
  0x31   : > { %s387_s18 = sshll.u32 %s3568_s26, 4  ;;  %s3418_s19 = scalar_lea.vmem %s350_s20, 1024  ;;  %s388_s18 = int_to_ptr.vmem [resolvable:$true] %s387_s18 }
  0x32   : > { %p3419_p13 = scmp.ne.s32.totalorder %s350_s20, %s3418_s19  ;;  %p3426_p10 = scmp.lt.s32.totalorder %s350_s20, %s350_s20 }
  0x33   : > { %p3427_p3 = scmp.lt.s32.totalorder %s3418_s19, %s3418_s19 }
  0x34   : > { %p3421_p0 = pnand %p3419_p13, %p3357_p12 }
  0x35   : > { %3096 = dma.hbm_to_vmem [thread:$0]  (!%p3696_p11), %s4260_s8, 4096, %s372_s16, [#allocation10], %s3565_s15, %s3565_s15, %s3566_s17  }
  0x36   : > { %p3422_p5 = pneg %p3421_p0  ;;  %p3428_p7 = por %p3427_p3, %p3426_p10 }
  0x38   : > { %p3429_p9 = pnand %p3428_p7, %p3422_p5 }
  0x3a   : > { %3432 = shalt.err (!%p3429_p9)
}
  0x3b   : > { %s4261_s21 = smov 4   ;;  %s4262_s28 = smov 64  }
  0x3c   : > { %s4263_s4 = sld [smem:[#allocation20_spill]]  ;;  %s3444_s15 = scalar_lea.vmem %s388_s18, 4096 }
  0x3d   : > { %p3445_p1 = scmp.ne.s32.totalorder %s388_s18, %s3444_s15  ;;  %p3452_p2 = scmp.lt.s32.totalorder %s388_s18, %s388_s18 }
  0x3e   : > { %p3453_p10 = scmp.lt.s32.totalorder %s3444_s15, %s3444_s15 }
  0x3f   : > { %p3447_p13 = pnand %p3445_p1, %p3357_p12 }
  0x40   : > { %p3454_p5 = por %p3453_p10, %p3452_p2 }
  0x41   : > { %p3448_p0 = pneg %p3447_p13 }
  0x42   : > { %3093 = dma.hbm_to_vmem [thread:$0]  (!%p3696_p11), %s4263_s4, 1024, %s350_s20, [#allocation7], %s4262_s28, %s4262_s28, %s4261_s21  }
  0x43   : > { %p3455_p3 = pnand %p3454_p5, %p3448_p0 }
  0x45   : > { %3458 = shalt.err (!%p3455_p3)
}
  0x46   : > { %s4264_s10 = sld [smem:[#allocation22_spill]]  ;;  %s3744_s13 = sadd.s32 1, %s3559_s24  }
  0x47   : > { %s34_s14 = ssub.s32 %s3559_s24, %s3744_s13  ;;  %s37_s20 = sadd.s32 1, %s3555_s23 }
  0x48   : > { %p35_p1 = scmp.eq.s32.totalorder %s34_s14, 0  ;;  %p44_p2 = scmp.ne.s32.totalorder %s3555_s23, %s3551_s22 }
  0x49   : > { %p45_p12 = scmp.eq.s32.totalorder %s3559_s24, 0  ;;  %p4265_p9 = scmp.eq.s32.totalorder %s3668_s25, 1 }
  0x4a   : > { %s3753_s26 = scalar_select %p35_p1, %s3555_s23, %s37_s20  }
  0x4b   : > { %p46_p7 = por %p45_p12, %p44_p2  ;;  %p3757_p13 = por %p4265_p9, %p44_p2 }
  0x4c   : > { %3099 = dma.hbm_to_vmem [thread:$0]  (!%p3696_p11), %s4264_s10, 4096, %s388_s18, [#allocation10], %s4262_s28, %s4262_s28, %s4261_s21  }
  0x4d   : > { %s4266_s16 = scalar_select %p3757_p13, 1, 0 }
  0x4e   : > { %p3112_p0 = scmp.lt.s32.totalorder %s3559_s24, 2  ;;  %s404_s30 = sand.u32 1, %s3555_s23  }
  0x4f   : > { %s2704_s15 = sshll.u32 %s404_s30, 4  ;;  %s2829_s18 = sshll.u32 %s3559_s24, 8 }
  0x50   : > { %s3767_s19 = scalar_lea.hbm %s4226_s0, %s2829_s18  ;;  %s408_s17 = scalar_lea.vmem [#allocation3], %s2704_s15 }
  0x51   : > { %s415_s14 = sshll.u32 %s408_s17, 4  ;;  %p3771_p11 = pnand %p3112_p0, %p46_p7  ;;  %s3769_s14 = int_to_ptr.vmem [resolvable:$true] %s415_s14 }
  0x52   : > { %s3775_s3 = scalar_lea.sflag [#allocation4], %s404_s30  ;;  %s3459_s4 = scalar_lea.hbm %s3767_s19, 256 }
  0x53   : > { %p3460_p10 = scmp.ne.s32.totalorder %s3767_s19, %s3459_s4  ;;  %p3461_p5 = pneg %p3771_p11 }
  0x54   : > { %s3464_s15 = scalar_lea.hbm %s4226_s0, 512  ;;  %p3465_p2 = scmp.lt.s32.totalorder %s3767_s19, %s4226_s0 }
  0x55   : > { %p3462_p3 = pnand %p3461_p5, %p3460_p10  ;;  %p3466_p12 = scmp.lt.s32.totalorder %s3464_s15, %s3459_s4 }
  0x57   : > { %p3463_p1 = pneg %p3462_p3  ;;  %p3467_p7 = por %p3466_p12, %p3465_p2 }
  0x59   : > { %p3468_p9 = pnand %p3467_p7, %p3463_p1 }
  0x5b   : > { %3471 = shalt.err (!%p3468_p9)
}
  0x5c   : > { %s3472_s30 = scalar_lea.vmem %s3769_s14, 256  ;;  %s3569_s8 = smov [#allocation3]  }
  0x5d   : > { %p3473_p0 = scmp.ne.s32.totalorder %s3769_s14, %s3472_s30  ;;  %s3477_s10 = sshll.u32 %s3569_s8, 4  ;;  %s3478_s10 = int_to_ptr.vmem [resolvable:$false] %s3477_s10 }
  0x5e   : > { %s3479_s18 = scalar_lea.vmem %s3478_s10, 512  ;;  %p3480_p3 = scmp.lt.s32.totalorder %s3769_s14, %s3478_s10 }
  0x5f   : > { %p3475_p6 = pnand %p3473_p0, %p3461_p5  ;;  %p3481_p13 = scmp.lt.s32.totalorder %s3479_s18, %s3472_s30 }
  0x61   : > { %p3476_p10 = pneg %p3475_p6  ;;  %p3482_p4 = por %p3481_p13, %p3480_p3 }
  0x63   : > { %p3483_p8 = pnand %p3482_p4, %p3476_p10 }
  0x65   : > { %3486 = shalt.err (!%p3483_p8)
}
  0x66   : > { %s3570_s4 = smov 128   ;;  %s3571_s21 = smov 8  }
  0x67   : > { %3103 = dma.hbm_to_vmem [thread:$0]  (!%p3771_p11), %s3767_s19, 256, %s3769_s14, %s3775_s3, %s3570_s4, %s3570_s4, %s3571_s21  }
  0x68   : > { %p4268_p5 = scmp.ne.s32.totalorder %s4257_s29, 0 }
  0x69   : > { %s3799_s8 = sand.u32 (!%p4268_p5), 1, %s3551_s22   ;;  %p4269_p4 = scmp.ne.s32.totalorder (!%p4268_p5), %s4254_s27, 0 }
  0x6a   : > { %427 = sbr.rel (%p4268_p5) target bundleno = 4119 (0x1017), region = 68  ;;  %s2708_s10 = sshll.u32 (!%p4268_p5), %s3799_s8, 4 }
  0x6b   : > { %s430_s15 = scalar_lea.sflag (!%p4268_p5), [#allocation4], %s3799_s8  ;;  %s3805_s28 = scalar_lea.vmem (!%p4268_p5), [#allocation3], %s2708_s10 }
  0x6f   : > { %3530 = dma.done.wait (%p4269_p4), %s430_s15, 256  }
  0x70   : > { %3532 = vsyncadd (%p4269_p4), %s430_s15, 4294967040  ;;  %p4270_p6 = scmp.eq.s32.totalorder %s3668_s25, 0 }
  0x72   : > { %3534 = dma.done.wait (%p4270_p6), [#allocation7], 4096   ;;  %p4271_p8 = pmov %p4270_p6 }
  0x73   : > { %p4272_p13 = pmov %p4270_p6 }
  0x74   : > { %3536 = vsyncadd (%p4271_p8), [#allocation7], 4294963200 }
  0x75   : > { %3538 = dma.done.wait (%p4272_p13), [#allocation10], 8192   ;;  %p4273_p11 = pmov %p4270_p6 }
  0x76   : > { %v491_v0 = vld [vmem:[%s3805_s28] sm:$0xff]  ;;  %v492_v1 = vld [vmem:[%s3805_s28 + $0x8] sm:$0xff]  ;;  %v3572_v37 = vmov 0.0   ;;  %vm3573_vm0 = vmmov 0   ;;  %vm972_vm1 = vcmask 261120   ;;  %vm1017_vm2 = vcmask 130048  }
  0x77   : > { %3540 = vsyncadd (%p4273_p11), [#allocation10], 4294959104  ;;  %495 = vadd.xlane.f32.xlu0 %v491_v0  ;;  %v3169_v10 = vld [vmem:[#allocation6] sm:$0xff]   ;;  %v2714_v19 = vld [vmem:[%s4227_s1] ss:$0 sm:$0xff]  ;;  %2983 = vmatprep.subr.bf16.mxu1 %v3572_v37  ;;  %s3574_s14 = smov 32  }
  0x78   : > { %2935 = vmatprep.mubr.bf16.mxu0 %v3169_v10  ;;  %v2715_v23 = vld [vmem:[%s4228_s2] ss:$0 sm:$0xff]  ;;  %v3170_v28 = vld [vmem:[#allocation6 + $0x8] sm:$0xff]   ;;  %v3172_v30 = vld [vmem:[#allocation6 + $0x18] sm:$0xff]   ;;  %2987 = vmatprep.mubr.msk.bf16.mxu1 %vm3573_vm0, %v3572_v37  ;;  %vm1242_vm3 = vcmask 523520   ;;  %s3575_s20 = smov 64  }
  0x79   : > { %v3171_v29 = vld [vmem:[#allocation6 + $0x10] sm:$0xff]   ;;  %v3173_v31 = vld [vmem:[#allocation6 + $0x20] sm:$0xff]   ;;  %v3174_v32 = vld [vmem:[#allocation6 + $0x28] sm:$0xff]   ;;  %vm1392_vm4 = vcmask 785920   ;;  %s3576_s17 = smov 96   ;;  %vm1542_vm5 = vcmask 1048320  }
  0x7a   : > { %v3175_v33 = vld [vmem:[#allocation6 + $0x30] sm:$0xff]   ;;  %v3176_v34 = vld [vmem:[#allocation6 + $0x38] sm:$0xff]   ;;  %v3177_v35 = vld [vmem:[#allocation6 + $0x40] sm:$0xff]   ;;  %p4274_p2 = scmp.ne.s32.totalorder %s4266_s16, 0 }
  0x7b   : > { %497 = vadd.xlane.f32.xlu0 %v492_v1  ;;  %v3178_v36 = vld [vmem:[#allocation6 + $0x48] sm:$0xff]   ;;  %v3184_v10 = vld [vmem:[#allocation6 + $0x78] sm:$0xff]  }
 0x100   : > { %v496_v2 = vpop.xlane.xlu0 %495 }
 0x101   : > { %v500_v3 = vmul.f32 0.0078125, %v496_v2 }
 0x103   : > { %v502_v4 = vsub.f32 %v491_v0, %v500_v3 }
 0x104   : > { %v498_v5 = vpop.xlane.xlu0 %497 }
 0x105   : > { %v501_v6 = vmul.f32 0.0078125, %v498_v5  ;;  %v504_v7 = vmul.f32 %v502_v4, %v502_v4  ;;  %v3179_v5 = vld [vmem:[#allocation6 + $0x50] sm:$0xff]  }
 0x107   : > { %v503_v8 = vsub.f32 %v492_v1, %v501_v6  ;;  %506 = vadd.xlane.f32.xlu1 %v504_v7  ;;  %v3180_v6 = vld [vmem:[#allocation6 + $0x58] sm:$0xff]   ;;  %v3181_v7 = vld [vmem:[#allocation6 + $0x60] sm:$0xff]  }
 0x109   : > { %v505_v9 = vmul.f32 %v503_v8, %v503_v8 }
 0x10b   : > { %508 = vadd.xlane.f32.xlu1 %v505_v9  ;;  %v3183_v9 = vld [vmem:[#allocation6 + $0x70] sm:$0xff]  }
 0x190   : > { %v507_v11 = vpop.xlane.xlu1 %506 }
 0x191   : > { %v510_v12 = vmul.f32 0.0078125, %v507_v11  ;;  %v3185_v11 = vld [vmem:[#allocation6 + $0x80] sm:$0xff]  }
 0x193   : > { %v512_v13 = vadd.f32 1e-05, %v510_v12  ;;  %v3186_v12 = vld [vmem:[#allocation6 + $0x88] sm:$0xff]  }
 0x194   : > { %v509_v14 = vpop.xlane.xlu1 %508 }
 0x195   : > { %3281 = vrsqrt.f32 %v512_v13  ;;  %v511_v15 = vmul.f32 0.0078125, %v509_v14 }
 0x197   : > { %v513_v16 = vadd.f32 1e-05, %v511_v15 }
 0x199   : > { %3283 = vrsqrt.f32 %v513_v16 }
 0x1a2   : > { %v3282_v17 = vpop.eup %3281 }
 0x1a3   : > { %v516_v18 = vmul.f32 %v3282_v17, %v502_v4 }
 0x1a5   : > { %v524_v22 = vmul.f32 %v2714_v19, %v516_v18 }
 0x1a6   : > { %v3284_v20 = vpop.eup %3283 }
 0x1a7   : > { %v517_v21 = vmul.f32 %v3284_v20, %v503_v8  ;;  %v532_v25 = vadd.f32 %v2715_v23, %v524_v22  ;;  %v3182_v8 = vld [vmem:[#allocation6 + $0x68] sm:$0xff]  }
 0x1a9   : > { %v525_v24 = vmul.f32 %v2714_v19, %v517_v21 }
 0x1ab   : > { %v533_v26 = vadd.f32 %v2715_v23, %v525_v24 }
 0x1ad   : > { %v582_v27 = vpack.c.bf16 %v533_v26, %v532_v25 }
 0x1af   : > { %2933 = vmatprep.subr.bf16.mxu0 %v582_v27 }
 0x1b0   : > { %2934 = vmatpush3.bf16.xpose.msra.mxu0 %v582_v27 }
 0x1b1   : > { %3047 = vmatprep.subr.bf16.mxu0 %v3572_v37 }
 0x1b7   : > { %2936 = vmatmul.mubr.bf16.vlgmr.msra.gmra.mxu0 %v3170_v28 }
 0x1b8   : > { %2939 = vmatprep.mubr.bf16.mxu0 %v3171_v29 }
 0x1bf   : > { %2940 = vmatmul.mubr.bf16.gmra.mxu0 %v3172_v30 }
 0x1c0   : > { %2943 = vmatprep.mubr.bf16.mxu0 %v3173_v31 }
 0x1c7   : > { %2944 = vmatmul.mubr.bf16.gmra.mxu0 %v3174_v32 }
 0x1c8   : > { %2947 = vmatprep.mubr.bf16.mxu0 %v3175_v33 }
 0x1cf   : > { %2948 = vmatmul.mubr.bf16.gmra.mxu0 %v3176_v34 }
 0x1d0   : > { %2951 = vmatprep.mubr.bf16.mxu0 %v3177_v35 }
 0x1d7   : > { %2952 = vmatmul.mubr.bf16.gmra.mxu0 %v3178_v36 }
 0x1d8   : > { %2955 = vmatprep.mubr.bf16.mxu0 %v3179_v5 }
 0x1df   : > { %2956 = vmatmul.mubr.bf16.gmra.mxu0 %v3180_v6 }
 0x1e0   : > { %2959 = vmatprep.mubr.bf16.mxu0 %v3181_v7 }
 0x1e7   : > { %2960 = vmatmul.mubr.bf16.gmra.mxu0 %v3182_v8 }
 0x1e8   : > { %2963 = vmatprep.mubr.bf16.mxu0 %v3183_v9 }
 0x1ef   : > { %2964 = vmatmul.mubr.bf16.gmra.mxu0 %v3184_v10 }
 0x1f0   : > { %2967 = vmatprep.mubr.bf16.mxu0 %v3185_v11 }
 0x1f7   : > { %2968 = vmatmul.mubr.bf16.gmra.mxu0 %v3186_v12 }
 0x277   : > { %v2937_v38 = vpop.f32.mrf.mxu0 }
 0x279   : > { %v761_v39 = vpop.f32.mrf.mxu0 }
 0x27b   : > { %v2938_v40 = vpop.f32.mrf.mxu0 }
 0x27c   : > { %v953_v45 = vpack.c.bf16 %v2938_v40, %v2937_v38 }
 0x27d   : > { %v764_v41 = vpop.f32.mrf.mxu0 }
 0x27e   : > { %v952_v42 = vpack.c.bf16 %v764_v41, %v761_v39 }
 0x27f   : > { %v3831_v43 = vpop.f32.mrf.mxu0 }
 0x280   : > { %956 = vxpose.xlu0.c.b16.start [1/2] (short) (narrow) %v952_v42, 16 }
 0x281   : > { %v3833_v44 = vpop.f32.mrf.mxu0 }
 0x283   : > { %v3835_v46 = vpop.f32.mrf.mxu0 }
 0x284   : > { %957 = vxpose.xlu0.c.b16.end [2/2] (short) (narrow) %v953_v45, 16  ;;  %v1096_v47 = vpack.c.bf16 %v3835_v46, %v3831_v43  ;;  %v3188_v46 = vld [vmem:[#allocation6 + $0x98] sm:$0xff]  }
 0x285   : > { %v3839_v48 = vpop.f32.mrf.mxu0 }
 0x286   : > { %v1095_v49 = vpack.c.bf16 %v3839_v48, %v3833_v44  ;;  %v3187_v44 = vld [vmem:[#allocation6 + $0x90] sm:$0xff]  }
 0x287   : > { %v3843_v50 = vpop.f32.mrf.mxu0  ;;  %2971 = vmatprep.mubr.bf16.mxu0 %v3187_v44 }
 0x288   : > { %2972 = vmatmul.mubr.bf16.gmra.mxu0 %v3188_v46 }
 0x289   : > { %v3845_v51 = vpop.f32.mrf.mxu0 }
 0x28b   : > { %v3847_v52 = vpop.f32.mrf.mxu0 }
 0x28c   : > { %v1246_v53 = vpack.c.bf16 %v3847_v52, %v3843_v50  ;;  %v3190_v52 = vld [vmem:[#allocation6 + $0xa8] sm:$0xff]  }
 0x28d   : > { %v3851_v54 = vpop.f32.mrf.mxu0 }
 0x28e   : > { %v1245_v55 = vpack.c.bf16 %v3851_v54, %v3845_v51  ;;  %v3189_v51 = vld [vmem:[#allocation6 + $0xa0] sm:$0xff]  }
 0x28f   : > { %v3855_v56 = vpop.f32.mrf.mxu0  ;;  %2975 = vmatprep.mubr.bf16.mxu0 %v3189_v51 }
 0x290   : > { %2976 = vmatmul.mubr.bf16.gmra.mxu0 %v3190_v52 }
 0x291   : > { %v3857_v57 = vpop.f32.mrf.mxu0 }
 0x293   : > { %v3859_v58 = vpop.f32.mrf.mxu0 }
 0x294   : > { %v1396_v59 = vpack.c.bf16 %v3859_v58, %v3855_v56  ;;  %v3191_v58 = vld [vmem:[#allocation6 + $0xb0] sm:$0xff]  }
 0x295   : > { %v3863_v60 = vpop.f32.mrf.mxu0  ;;  %2979 = vmatprep.mubr.bf16.mxu0 %v3191_v58 }
 0x296   : > { %v1395_v61 = vpack.c.bf16 %v3863_v60, %v3857_v57 }
 0x297   : > { %v2953_v62 = vpop.f32.mrf.mxu0 }
 0x299   : > { %v825_v63 = vpop.f32.mrf.mxu0 }
 0x29b   : > { %v2954_v0 = vpop.f32.mrf.mxu0 }
 0x29c   : > { %v955_v1 = vpack.c.bf16 %v2954_v0, %v2953_v62 }
 0x29d   : > { %v828_v2 = vpop.f32.mrf.mxu0 }
 0x29e   : > { %2984 = vmatpush3.bf16.msra.mxu1 %v955_v1  ;;  %v954_v3 = vpack.c.bf16 %v828_v2, %v825_v63 }
 0x29f   : > { %2985 = vmatprep.subr.bf16.mxu1 %v3572_v37  ;;  %v2957_v19 = vpop.f32.mrf.mxu0 }
 0x2a1   : > { %v841_v20 = vpop.f32.mrf.mxu0 }
 0x2a2   : > { %2986 = vmatpush3.bf16.msra.mxu1 %v954_v3 }
 0x2a3   : > { %2991 = vmatprep.subr.bf16.mxu1 %v3572_v37  ;;  %v2958_v21 = vpop.f32.mrf.mxu0 }
 0x2a4   : > { %v1098_v22 = vpack.c.bf16 %v2958_v21, %v2957_v19 }
 0x2a5   : > { %v844_v23 = vpop.f32.mrf.mxu0 }
 0x2a6   : > { %v1097_v24 = vpack.c.bf16 %v844_v23, %v841_v20 }
 0x2a7   : > { %v3874_v25 = vpop.f32.mrf.mxu0 }
 0x2a9   : > { %v3876_v26 = vpop.f32.mrf.mxu0 }
 0x2ab   : > { %v3878_v27 = vpop.f32.mrf.mxu0 }
 0x2ac   : > { %v1248_v28 = vpack.c.bf16 %v3878_v27, %v3874_v25 }
 0x2ad   : > { %v3882_v29 = vpop.f32.mrf.mxu0 }
 0x2ae   : > { %v1247_v30 = vpack.c.bf16 %v3882_v29, %v3876_v26 }
 0x2af   : > { %v3886_v31 = vpop.f32.mrf.mxu0 }
 0x2b1   : > { %v3888_v32 = vpop.f32.mrf.mxu0 }
 0x2b3   : > { %v3890_v33 = vpop.f32.mrf.mxu0 }
 0x2b4   : > { %v1398_v34 = vpack.c.bf16 %v3890_v33, %v3886_v31 }
 0x2b5   : > { %v3894_v35 = vpop.f32.mrf.mxu0 }
 0x2b6   : > { %v1397_v36 = vpack.c.bf16 %v3894_v35, %v3888_v32 }
 0x2b7   : > { %v2969_v38 = vpop.f32.mrf.mxu0 }
 0x2b9   : > { %v889_v39 = vpop.f32.mrf.mxu0 }
 0x2bb   : > { %v2970_v40 = vpop.f32.mrf.mxu0 }
 0x2bc   : > { %v1042_v41 = vpack.c.bf16 %v2970_v40, %v2969_v38 }
 0x2bd   : > { %v892_v42 = vpop.f32.mrf.mxu0 }
 0x2be   : > { %v1050_v45 = vsel %vm1017_vm2, %v1042_v41, 0  ;;  %v1041_v62 = vpack.c.bf16 %v892_v42, %v889_v39 }
 0x2c0   : > { %v1047_v63 = vsel %vm1017_vm2, %v1041_v62, 0 }
 0x2e2   : > { %v964_v4 = vpop.trf.xlu0 }
 0x2e3   : > { %2988 = vmatmul.mubr.msk.bf16.vlgmr.msra.gmra.mxu1 %vm972_vm1, %v964_v4 }
 0x2e4   : > { %2995 = vmatprep.mubr.msk.bf16.mxu1 %vm3573_vm0, %v3572_v37  ;;  %2992 = vmatpush3.bf16.xpose.msra.mxu1 %v1050_v45 }
 0x2e5   : > { %2993 = vmatprep.subr.bf16.mxu1 %v3572_v37 }
 0x2ec   : > { %2994 = vmatpush3.bf16.xpose.msra.mxu1 %v1047_v63 }
 0x2ed   : > { %2999 = vmatprep.subr.bf16.mxu1 %v3572_v37 }
 0x3a3   : > { %v1010_v13 = vpop.f32.mrf.mxu1 }
 0x3a4   : > { %v1018_v14 = vsel %vm1017_vm2, %v1010_v13, -inf }
 0x3a5   : > { %1019 = vmax.xlane.f32.xlu1 %v1018_v14  ;;  %v2989_v15 = vpop.f32.mrf.mxu1 }
 0x3a7   : > { %v1013_v16 = vpop.f32.mrf.mxu1 }
 0x3a8   : > { %v1021_v17 = vsel %vm1017_vm2, %v1013_v16, -inf }
 0x3a9   : > { %1022 = vmax.xlane.f32.xlu1 %v1021_v17  ;;  %v2990_v18 = vpop.f32.mrf.mxu1 }
 0x42e   : > { %v1020_v0 = vpop.xlane.xlu1 %1019 }
 0x42f   : > { %v1024_v1 = vsub.f32 %v1010_v13, %v1020_v0 }
 0x431   : > { %v1026_v2 = vmul.f32 1.442695, %v1024_v1 }
 0x432   : > { %v1023_v3 = vpop.xlane.xlu1 %1022 }
 0x433   : > { %3285 = vpow2.f32 %v1026_v2  ;;  %v1025_v4 = vsub.f32 %v1013_v16, %v1023_v3 }
 0x435   : > { %v1028_v5 = vmul.f32 1.442695, %v1025_v4 }
 0x437   : > { %3287 = vpow2.f32 %v1028_v5 }
 0x440   : > { %v3286_v6 = vpop.eup %3285 }
 0x441   : > { %v1030_v7 = vsel %vm1017_vm2, %v3286_v6, 0.0 }
 0x442   : > { %1031 = vadd.xlane.f32.xlu1 %v1030_v7 }
 0x444   : > { %v3288_v8 = vpop.eup %3287 }
 0x445   : > { %v1033_v9 = vsel %vm1017_vm2, %v3288_v8, 0.0 }
 0x446   : > { %1034 = vadd.xlane.f32.xlu1 %v1033_v9 }
 0x473   : > { %1099 = vxpose.xlu1.c.b16.start [1/2] (short) (narrow) %v1095_v49, 16 }
 0x477   : > { %1100 = vxpose.xlu1.c.b16.end [2/2] (short) (narrow) %v1096_v47, 16 }
 0x4cb   : > { %v1032_v10 = vpop.xlane.xlu1 %1031 }
 0x4cc   : > { %3289 = vrcp.f32 %v1032_v10 }
 0x4cf   : > { %v1035_v11 = vpop.xlane.xlu1 %1034 }
 0x4d0   : > { %3291 = vrcp.f32 %v1035_v11 }
 0x4d5   : > { %v1107_v43 = vpop.trf.xlu1 }
 0x4d9   : > { %v3290_v12 = vpop.eup %3289 }
 0x4da   : > { %v1038_v14 = vmul.f32 %v3290_v12, %v3286_v6 }
 0x4dd   : > { %v3292_v13 = vpop.eup %3291 }
 0x4de   : > { %v1039_v15 = vmul.f32 %v3292_v13, %v3288_v8 }
 0x4e0   : > { %v1040_v16 = vpack.c.bf16 %v1039_v15, %v1038_v14 }
 0x4e2   : > { %2996 = vmatmul.mubr.msk.bf16.vlgmr.msra.gmra.mxu1 %vm1017_vm2, %v1040_v16 }
 0x4e3   : > { %3000 = vmatpush3.bf16.msra.mxu1 %v1098_v22  ;;  %3003 = vmatprep.mubr.msk.bf16.mxu1 %vm3573_vm0, %v3572_v37 }
 0x4e4   : > { %3001 = vmatprep.subr.bf16.mxu1 %v3572_v37 }
 0x4e7   : > { %3002 = vmatpush3.bf16.msra.mxu1 %v1097_v24  ;;  %v2973_v24 = vpop.f32.mrf.mxu0 }
 0x4e8   : > { %3007 = vmatprep.subr.bf16.mxu1 %v3572_v37 }
 0x4e9   : > { %v905_v38 = vpop.f32.mrf.mxu0 }
 0x4ea   : > { %3004 = vmatmul.mubr.msk.bf16.vlgmr.msra.gmra.mxu1 %vm972_vm1, %v1107_v43 }
 0x4eb   : > { %3011 = vmatprep.mubr.msk.bf16.mxu1 %vm3573_vm0, %v3572_v37  ;;  %v2974_v39 = vpop.f32.mrf.mxu0 }
 0x4ec   : > { %v1183_v40 = vpack.c.bf16 %v2974_v39, %v2973_v24 }
 0x4ed   : > { %v908_v41 = vpop.f32.mrf.mxu0 }
 0x4ee   : > { %v1191_v42 = vsel %vm1017_vm2, %v1183_v40, 0  ;;  %v1182_v45 = vpack.c.bf16 %v908_v41, %v905_v38 }
 0x4ef   : > { %3008 = vmatpush3.bf16.xpose.msra.mxu1 %v1191_v42  ;;  %v2977_v43 = vpop.f32.mrf.mxu0 }
 0x4f0   : > { %3009 = vmatprep.subr.bf16.mxu1 %v3572_v37  ;;  %v1188_v62 = vsel %vm1017_vm2, %v1182_v45, 0 }
 0x4f1   : > { %v921_v44 = vpop.f32.mrf.mxu0 }
 0x4f3   : > { %v2978_v46 = vpop.f32.mrf.mxu0 }
 0x4f7   : > { %3010 = vmatpush3.bf16.xpose.msra.mxu1 %v1188_v62 }
 0x4f8   : > { %3015 = vmatprep.subr.bf16.mxu1 %v3572_v37 }
 0x5a2   : > { %v1086_v47 = vpop.f32.mrf.mxu1 }
 0x5a3   : > { %1093 = vst.msk [vmem:[#allocation2] sm:$0xff] %vm972_vm1, %v1086_v47  ;;  %v1333_v47 = vpack.c.bf16 %v2978_v46, %v2977_v43 }
 0x5a4   : > { %v2997_v48 = vpop.f32.mrf.mxu1 }
 0x5a5   : > { %v924_v48 = vpop.f32.mrf.mxu0 }
 0x5a6   : > { %v1089_v49 = vpop.f32.mrf.mxu1 }
 0x5a7   : > { %1094 = vst.msk [vmem:[#allocation2 + $0x8] sm:$0xff] %vm972_vm1, %v1089_v49  ;;  %v1341_v49 = vsel %vm1017_vm2, %v1333_v47, 0 }
 0x5a8   : > { %v2998_v17 = vpop.f32.mrf.mxu1 }
 0x5a9   : > { %v1332_v17 = vpack.c.bf16 %v924_v48, %v921_v44 }
 0x5aa   : > { %v1152_v18 = vpop.f32.mrf.mxu1 }
 0x5ab   : > { %v1159_v19 = vsel %vm1017_vm2, %v1152_v18, -inf }
 0x5ac   : > { %1160 = vmax.xlane.f32.xlu0 %v1159_v19  ;;  %v3005_v20 = vpop.f32.mrf.mxu1 }
 0x5ae   : > { %v1155_v21 = vpop.f32.mrf.mxu1 }
 0x5af   : > { %v1162_v22 = vsel %vm1017_vm2, %v1155_v21, -inf }
 0x5b0   : > { %1163 = vmax.xlane.f32.xlu0 %v1162_v22  ;;  %v3006_v23 = vpop.f32.mrf.mxu1 }
 0x635   : > { %v1161_v63 = vpop.xlane.xlu0 %1160 }
 0x636   : > { %v1165_v0 = vsub.f32 %v1152_v18, %v1161_v63  ;;  %v1338_v18 = vsel %vm1017_vm2, %v1332_v17, 0  ;;  %v3195_v17 = vld [vmem:[#allocation8 + $0x28] sm:$0xff]  }
 0x638   : > { %v1167_v1 = vmul.f32 1.442695, %v1165_v0 }
 0x639   : > { %v1164_v2 = vpop.xlane.xlu0 %1163 }
 0x63a   : > { %3293 = vpow2.f32 %v1167_v1  ;;  %v1166_v3 = vsub.f32 %v1155_v21, %v1164_v2 }
 0x63c   : > { %v1169_v4 = vmul.f32 1.442695, %v1166_v3 }
 0x63e   : > { %3295 = vpow2.f32 %v1169_v4 }
 0x647   : > { %v3294_v5 = vpop.eup %3293 }
 0x648   : > { %v1171_v6 = vsel %vm1017_vm2, %v3294_v5, 0.0 }
 0x649   : > { %1172 = vadd.xlane.f32.xlu1 %v1171_v6 }
 0x64b   : > { %v3296_v7 = vpop.eup %3295 }
 0x64c   : > { %v1174_v8 = vsel %vm1017_vm2, %v3296_v7, 0.0 }
 0x64d   : > { %1175 = vadd.xlane.f32.xlu0 %v1174_v8 }
 0x67a   : > { %1249 = vxpose.xlu0.c.b16.start [1/2] (short) (narrow) %v1245_v55, 16 }
 0x67e   : > { %1250 = vxpose.xlu0.c.b16.end [2/2] (short) (narrow) %v1246_v53, 16 }
 0x6d2   : > { %v1173_v9 = vpop.xlane.xlu1 %1172 }
 0x6d3   : > { %3297 = vrcp.f32 %v1173_v9 }
 0x6d6   : > { %v1176_v10 = vpop.xlane.xlu0 %1175 }
 0x6d7   : > { %3299 = vrcp.f32 %v1176_v10 }
 0x6dc   : > { %v1257_v50 = vpop.trf.xlu0 }
 0x6e0   : > { %v3298_v11 = vpop.eup %3297 }
 0x6e1   : > { %v1179_v13 = vmul.f32 %v3298_v11, %v3294_v5 }
 0x6e4   : > { %v3300_v12 = vpop.eup %3299 }
 0x6e5   : > { %v1180_v14 = vmul.f32 %v3300_v12, %v3296_v7 }
 0x6e7   : > { %v1181_v15 = vpack.c.bf16 %v1180_v14, %v1179_v13 }
 0x6e9   : > { %3012 = vmatmul.mubr.msk.bf16.vlgmr.msra.gmra.mxu1 %vm1017_vm2, %v1181_v15 }
 0x6ea   : > { %3016 = vmatpush3.bf16.msra.mxu1 %v1248_v28  ;;  %3019 = vmatprep.mubr.msk.bf16.mxu1 %vm3573_vm0, %v3572_v37 }
 0x6eb   : > { %3017 = vmatprep.subr.bf16.mxu1 %v3572_v37 }
 0x6ee   : > { %3018 = vmatpush3.bf16.msra.mxu1 %v1247_v30 }
 0x6ef   : > { %3023 = vmatprep.subr.bf16.mxu1 %v3572_v37 }
 0x6f1   : > { %3020 = vmatmul.mubr.msk.bf16.vlgmr.msra.gmra.mxu1 %vm972_vm1, %v1257_v50 }
 0x6f2   : > { %3027 = vmatprep.mubr.msk.bf16.mxu1 %vm3573_vm0, %v3572_v37  ;;  %3024 = vmatpush3.bf16.xpose.msra.mxu1 %v1341_v49  ;;  %v3193_v49 = vld [vmem:[#allocation8 + $0x38] sm:$0xff]  }
 0x6f3   : > { %3025 = vmatprep.subr.bf16.mxu1 %v3572_v37  ;;  %3048 = vmatpush3.bf16.msra.mxu0 %v3193_v49  ;;  %v3240_v49 = vld [vmem:[#allocation9 + $0x28] ss:$16 sps:$4 sm:$0xff]  }
 0x6f4   : > { %3049 = vmatprep.subr.bf16.mxu0 %v3572_v37 }
 0x6fa   : > { %3026 = vmatpush3.bf16.xpose.msra.mxu1 %v1338_v18  ;;  %v3196_v18 = vld [vmem:[#allocation8 + $0x20] sm:$0xff]  }
 0x6fb   : > { %3031 = vmatprep.subr.bf16.mxu1 %v3572_v37 }
 0x7a9   : > { %v1227_v53 = vpop.f32.mrf.mxu1 }
 0x7ab   : > { %v3013_v54 = vpop.f32.mrf.mxu1 }
 0x7ad   : > { %v3948_v55 = vpop.f32.mrf.mxu1 }
 0x7af   : > { %v3014_v25 = vpop.f32.mrf.mxu1 }
 0x7b1   : > { %v1302_v27 = vpop.f32.mrf.mxu1 }
 0x7b2   : > { %v1309_v26 = vsel %vm1017_vm2, %v1302_v27, -inf }
 0x7b3   : > { %1310 = vmax.xlane.f32.xlu1 %v1309_v26  ;;  %v3021_v28 = vpop.f32.mrf.mxu1 }
 0x7b5   : > { %v1305_v29 = vpop.f32.mrf.mxu1 }
 0x7b6   : > { %v1312_v30 = vsel %vm1017_vm2, %v1305_v29, -inf }
 0x7b7   : > { %1313 = vmax.xlane.f32.xlu1 %v1312_v30  ;;  %v3022_v16 = vpop.f32.mrf.mxu1 }
 0x83c   : > { %v1311_v19 = vpop.xlane.xlu1 %1310 }
 0x83d   : > { %v1315_v20 = vsub.f32 %v1302_v27, %v1311_v19  ;;  %v3197_v19 = vld [vmem:[#allocation8 + $0x18] sm:$0xff]  }
 0x83f   : > { %v1317_v21 = vmul.f32 1.442695, %v1315_v20  ;;  %v3198_v20 = vld [vmem:[#allocation8 + $0x10] sm:$0xff]  }
 0x840   : > { %v1314_v22 = vpop.xlane.xlu1 %1313 }
 0x841   : > { %3301 = vpow2.f32 %v1317_v21  ;;  %v1316_v23 = vsub.f32 %v1305_v29, %v1314_v22  ;;  %v3199_v21 = vld [vmem:[#allocation8 + $0x8] sm:$0xff]   ;;  %v3200_v22 = vld [vmem:[#allocation8] sm:$0xff]  }
 0x843   : > { %v1319_v24 = vmul.f32 1.442695, %v1316_v23 }
 0x845   : > { %3303 = vpow2.f32 %v1319_v24 }
 0x84e   : > { %v3302_v38 = vpop.eup %3301 }
 0x84f   : > { %v1321_v39 = vsel %vm1017_vm2, %v3302_v38, 0.0 }
 0x850   : > { %1322 = vadd.xlane.f32.xlu1 %v1321_v39 }
 0x852   : > { %v3304_v40 = vpop.eup %3303 }
 0x853   : > { %v1324_v41 = vsel %vm1017_vm2, %v3304_v40, 0.0 }
 0x854   : > { %1325 = vadd.xlane.f32.xlu1 %v1324_v41 }
 0x881   : > { %1399 = vxpose.xlu1.c.b16.start [1/2] (short) (narrow) %v1395_v61, 16 }
 0x885   : > { %1400 = vxpose.xlu1.c.b16.end [2/2] (short) (narrow) %v1396_v59, 16  ;;  %v3192_v59 = vld [vmem:[#allocation6 + $0xb8] sm:$0xff]  }
 0x886   : > { %2980 = vmatmul.mubr.bf16.gmra.mxu0 %v3192_v59 }
 0x887   : > { %3063 = vmatprep.mubr.msk.bf16.mxu0 %vm3573_vm0, %v3572_v37 }
 0x889   : > { %1236 = vrot.lane.b32.xlu1 %v1227_v53, %s3574_s14 }
 0x8d9   : > { %v1323_v42 = vpop.xlane.xlu1 %1322 }
 0x8da   : > { %3305 = vrcp.f32 %v1323_v42 }
 0x8dd   : > { %v1326_v45 = vpop.xlane.xlu1 %1325 }
 0x8de   : > { %3307 = vrcp.f32 %v1326_v45 }
 0x8e3   : > { %v1407_v56 = vpop.trf.xlu1 }
 0x8e7   : > { %v3306_v62 = vpop.eup %3305 }
 0x8e8   : > { %v1329_v0 = vmul.f32 %v3306_v62, %v3302_v38 }
 0x8eb   : > { %v3308_v63 = vpop.eup %3307 }
 0x8ec   : > { %v1330_v1 = vmul.f32 %v3308_v63, %v3304_v40 }
 0x8ee   : > { %v1331_v2 = vpack.c.bf16 %v1330_v1, %v1329_v0 }
 0x8f0   : > { %3028 = vmatmul.mubr.msk.bf16.vlgmr.msra.gmra.mxu1 %vm1017_vm2, %v1331_v2  ;;  %v3353_v2 = vld [vmem:[%s3805_s28] sm:$0xff] }
 0x8f1   : > { %3032 = vmatpush3.bf16.msra.mxu1 %v1398_v34  ;;  %3035 = vmatprep.mubr.msk.bf16.mxu1 %vm3573_vm0, %v3572_v37 }
 0x8f2   : > { %3033 = vmatprep.subr.bf16.mxu1 %v3572_v37 }
 0x8f5   : > { %3034 = vmatpush3.bf16.msra.mxu1 %v1397_v36 }
 0x8f6   : > { %3039 = vmatprep.subr.bf16.mxu1 %v3572_v37 }
 0x8f8   : > { %3036 = vmatmul.mubr.msk.bf16.vlgmr.msra.gmra.mxu1 %vm972_vm1, %v1407_v56 }
 0x8f9   : > { %3043 = vmatprep.mubr.msk.bf16.mxu1 %vm3573_vm0, %v3572_v37 }
 0x8fb   : > { %v1237_v57 = vpop.permute.xlu1 %1236 }
 0x8fc   : > { %1243 = vst.msk [vmem:[#allocation2] sm:$0xff] %vm1242_vm3, %v1237_v57 }
 0x946   : > { %v2981_v5 = vpop.f32.mrf.mxu0 }
 0x948   : > { %v937_v6 = vpop.f32.mrf.mxu0 }
 0x94a   : > { %v2982_v7 = vpop.f32.mrf.mxu0 }
 0x94b   : > { %v1483_v8 = vpack.c.bf16 %v2982_v7, %v2981_v5 }
 0x94c   : > { %v940_v25 = vpop.f32.mrf.mxu0 }
 0x94d   : > { %v1491_v9 = vsel %vm1017_vm2, %v1483_v8, 0  ;;  %v1482_v27 = vpack.c.bf16 %v940_v25, %v937_v6  ;;  %v3227_v25 = vld [vmem:[#allocation9 + $0x64] ss:$16 sps:$4 sm:$0xff]  }
 0x94e   : > { %3040 = vmatpush3.bf16.xpose.msra.mxu1 %v1491_v9  ;;  %v3209_v9 = vld [vmem:[#allocation9 + $0xc4] ss:$16 sps:$4 sm:$0xff]  }
 0x94f   : > { %3041 = vmatprep.subr.bf16.mxu1 %v3572_v37  ;;  %v1488_v26 = vsel %vm1017_vm2, %v1482_v27, 0  ;;  %v3230_v27 = vld [vmem:[#allocation9 + $0x6c] ss:$16 sps:$4 sm:$0xff]  }
 0x956   : > { %3042 = vmatpush3.bf16.xpose.msra.mxu1 %v1488_v26  ;;  %v3225_v26 = vld [vmem:[#allocation9 + $0x60] ss:$16 sps:$4 sm:$0xff]  }
 0x9b0   : > { %v1377_v60 = vpop.f32.mrf.mxu1 }
 0x9b1   : > { %1386 = vrot.lane.b32.xlu1 %v1377_v60, %s3575_s20  ;;  %v3354_v60 = vld [vmem:[%s3805_s28 + $0x8] sm:$0xff] }
 0x9b2   : > { %v3029_v61 = vpop.f32.mrf.mxu1 }
 0x9b4   : > { %v1380_v31 = vpop.f32.mrf.mxu1 }
 0x9b5   : > { %1388 = vrot.lane.b32.xlu1 %v1380_v31, %s3575_s20  ;;  %v3201_v31 = vld [vmem:[#allocation9 + $0xe0] ss:$16 sps:$4 sm:$0xff]  }
 0x9b6   : > { %v3030_v32 = vpop.f32.mrf.mxu1 }
 0x9b7   : > { %v3203_v32 = vld [vmem:[#allocation9 + $0xe4] ss:$16 sps:$4 sm:$0xff]  }
 0x9b8   : > { %v1452_v33 = vpop.f32.mrf.mxu1  ;;  %1917 = vmatprep.subr.bf16.mxu1 %v3203_v32  ;;  %v3254_v32 = vld [vmem:[#allocation11 + $0xf0] sm:$0xff]  }
 0x9b9   : > { %v1459_v34 = vsel %vm1017_vm2, %v1452_v33, -inf }
 0x9ba   : > { %1460 = vmax.xlane.f32.xlu0 %v1459_v34  ;;  %v3037_v35 = vpop.f32.mrf.mxu1  ;;  %v3206_v34 = vld [vmem:[#allocation9 + $0xec] ss:$16 sps:$4 sm:$0xff]  }
 0x9bc   : > { %v1455_v36 = vpop.f32.mrf.mxu1 }
 0x9bd   : > { %v1462_v3 = vsel %vm1017_vm2, %v1455_v36, -inf }
 0x9be   : > { %1463 = vmax.xlane.f32.xlu0 %v1462_v3  ;;  %v3038_v4 = vpop.f32.mrf.mxu1 }
 0xa23   : > { %v1387_v10 = vpop.permute.xlu1 %1386 }
 0xa24   : > { %1393 = vst.msk [vmem:[#allocation2] sm:$0xff] %vm1392_vm4, %v1387_v10  ;;  %v3212_v10 = vld [vmem:[#allocation9 + $0xcc] ss:$16 sps:$4 sm:$0xff]  }
 0xa27   : > { %v1389_v16 = vpop.permute.xlu1 %1388 }
 0xa43   : > { %v1461_v11 = vpop.xlane.xlu0 %1460 }
 0xa44   : > { %v1465_v12 = vsub.f32 %v1452_v33, %v1461_v11  ;;  %v3204_v33 = vld [vmem:[#allocation9 + $0xe8] ss:$16 sps:$4 sm:$0xff]   ;;  %v3207_v11 = vld [vmem:[#allocation9 + $0xc0] ss:$16 sps:$4 sm:$0xff]  }
 0xa46   : > { %v1467_v13 = vmul.f32 1.442695, %v1465_v12  ;;  %v3210_v12 = vld [vmem:[#allocation9 + $0xc8] ss:$16 sps:$4 sm:$0xff]  }
 0xa47   : > { %v1464_v14 = vpop.xlane.xlu0 %1463 }
 0xa48   : > { %3309 = vpow2.f32 %v1467_v13  ;;  %v1466_v15 = vsub.f32 %v1455_v36, %v1464_v14  ;;  %v3215_v13 = vld [vmem:[#allocation9 + $0xa4] ss:$16 sps:$4 sm:$0xff]   ;;  %v3218_v14 = vld [vmem:[#allocation9 + $0xac] ss:$16 sps:$4 sm:$0xff]  }
 0xa4a   : > { %v1469_v50 = vmul.f32 1.442695, %v1466_v15  ;;  %v3213_v15 = vld [vmem:[#allocation9 + $0xa0] ss:$16 sps:$4 sm:$0xff]  }
 0xa4c   : > { %3311 = vpow2.f32 %v1469_v50  ;;  %v3216_v50 = vld [vmem:[#allocation9 + $0xa8] ss:$16 sps:$4 sm:$0xff]  }
 0xa55   : > { %v3310_v51 = vpop.eup %3309 }
 0xa56   : > { %v1471_v52 = vsel %vm1017_vm2, %v3310_v51, 0.0 }
 0xa57   : > { %1472 = vadd.xlane.f32.xlu0 %v1471_v52  ;;  %v3221_v52 = vld [vmem:[#allocation9 + $0x84] ss:$16 sps:$4 sm:$0xff]  }
 0xa59   : > { %v3312_v53 = vpop.eup %3311 }
 0xa5a   : > { %v1474_v54 = vsel %vm1017_vm2, %v3312_v53, 0.0 }
 0xa5b   : > { %1475 = vadd.xlane.f32.xlu0 %v1474_v54  ;;  %v3224_v54 = vld [vmem:[#allocation9 + $0x8c] ss:$16 sps:$4 sm:$0xff]  }
 0xa71   : > { %1238 = vrot.lane.b32.xlu0 %v3948_v55, %s3574_s14  ;;  %v3194_v55 = vld [vmem:[#allocation8 + $0x30] sm:$0xff]   ;;  %s489_s14 = scalar_lea.vmem [#allocation12], %s2708_s10  ;;  %s2573_s10 = scalar_lea.sflag [#allocation5], %s3799_s8 }
 0xa72   : > { %3050 = vmatpush3.bf16.msra.mxu0 %v3194_v55  ;;  %v3245_v55 = vld [vmem:[#allocation9 + $0x4] ss:$16 sps:$4 sm:$0xff]   ;;  %s2586_s20 = sshll.u32 %s489_s14, 4  ;;  %s4177_s20 = int_to_ptr.vmem [resolvable:$true] %s2586_s20 }
 0xa73   : > { %3051 = vmatprep.subr.bf16.mxu0 %v3572_v37  ;;  %s3487_s21 = scalar_lea.vmem %s4177_s20, 256 }
 0xa74   : > { %p3488_p1 = scmp.ne.s32.totalorder %s4177_s20, %s3487_s21 }
 0xa76   : > { %3052 = vmatpush3.bf16.msra.mxu0 %v3195_v17  ;;  %v3248_v17 = vld [vmem:[#allocation9 + $0xc] ss:$16 sps:$4 sm:$0xff]   ;;  %p3489_p12 = pnand %p3488_p1, %p4274_p2 }
 0xa77   : > { %3053 = vmatprep.subr.bf16.mxu0 %v3572_v37 }
 0xa78   : > { %p3490_p7 = pneg %p3489_p12 }
 0xa7a   : > { %3054 = vmatpush3.bf16.msra.mxu0 %v3196_v18  ;;  %v3243_v18 = vld [vmem:[#allocation9] ss:$16 sps:$4 sm:$0xff]  }
 0xa7b   : > { %3055 = vmatprep.subr.bf16.mxu0 %v3572_v37 }
 0xa7e   : > { %3056 = vmatpush3.bf16.msra.mxu0 %v3197_v19  ;;  %v3246_v19 = vld [vmem:[#allocation9 + $0x8] ss:$16 sps:$4 sm:$0xff]  }
 0xa7f   : > { %3057 = vmatprep.subr.bf16.mxu0 %v3572_v37 }
 0xa82   : > { %3058 = vmatpush3.bf16.msra.mxu0 %v3198_v20 }
 0xa83   : > { %3059 = vmatprep.subr.bf16.mxu0 %v3572_v37 }
 0xa86   : > { %3060 = vmatpush3.bf16.msra.mxu0 %v3199_v21 }
 0xa87   : > { %3061 = vmatprep.subr.bf16.mxu0 %v3572_v37  ;;  %v2748_v37 = vld [vmem:[%s4231_s5] ss:$0 sm:$0xff] }
 0xa8a   : > { %3062 = vmatpush3.bf16.msra.mxu0 %v3200_v22 }
 0xa8b   : > { %1960 = vmatprep.subr.bf16.mxu0 %v3206_v34  ;;  %v3256_v34 = vld [vmem:[#allocation11 + $0xb0] sm:$0xff]  }
 0xae0   : > { %v1473_v28 = vpop.xlane.xlu0 %1472 }
 0xae1   : > { %3313 = vrcp.f32 %v1473_v28  ;;  %v3228_v28 = vld [vmem:[#allocation9 + $0x68] ss:$16 sps:$4 sm:$0xff]  }
 0xae4   : > { %v1476_v29 = vpop.xlane.xlu0 %1475 }
 0xae5   : > { %3315 = vrcp.f32 %v1476_v29  ;;  %v3233_v29 = vld [vmem:[#allocation9 + $0x44] ss:$16 sps:$4 sm:$0xff]  }
 0xae8   : > { %v1239_v30 = vpop.permute.xlu0 %1238 }
 0xae9   : > { %1244 = vst.msk [vmem:[#allocation2 + $0x8] sm:$0xff] %vm1242_vm3, %v1239_v30  ;;  %v3236_v30 = vld [vmem:[#allocation9 + $0x4c] ss:$16 sps:$4 sm:$0xff]  }
 0xaea   : > { %1394 = vst.msk [vmem:[#allocation2 + $0x8] sm:$0xff] %vm1392_vm4, %v1389_v16  ;;  %v3577_v16 = vmov 0  }
 0xaee   : > { %v3314_v43 = vpop.eup %3313 }
 0xaef   : > { %v1479_v46 = vmul.f32 %v3314_v43, %v3310_v51  ;;  %v3219_v51 = vld [vmem:[#allocation9 + $0x80] ss:$16 sps:$4 sm:$0xff]  }
 0xaf0   : > { %v3231_v43 = vld [vmem:[#allocation9 + $0x40] ss:$16 sps:$4 sm:$0xff]  }
 0xaf2   : > { %v3316_v44 = vpop.eup %3315 }
 0xaf3   : > { %v1480_v47 = vmul.f32 %v3316_v44, %v3312_v53  ;;  %v3222_v53 = vld [vmem:[#allocation9 + $0x88] ss:$16 sps:$4 sm:$0xff]  }
 0xaf4   : > { %v3234_v44 = vld [vmem:[#allocation9 + $0x48] ss:$16 sps:$4 sm:$0xff]  }
 0xaf5   : > { %v1481_v48 = vpack.c.bf16 %v1480_v47, %v1479_v46  ;;  %v3239_v46 = vld [vmem:[#allocation9 + $0x24] ss:$16 sps:$4 sm:$0xff]   ;;  %v3242_v47 = vld [vmem:[#allocation9 + $0x2c] ss:$16 sps:$4 sm:$0xff]  }
 0xaf7   : > { %3044 = vmatmul.mubr.msk.bf16.vlgmr.msra.gmra.mxu1 %vm1017_vm2, %v1481_v48  ;;  %v3237_v48 = vld [vmem:[#allocation9 + $0x20] ss:$16 sps:$4 sm:$0xff]  }
 0xaf8   : > { %1918 = vmatpush1.bf16.msra.mxu1 %v3201_v31  ;;  %1949 = vmatprep.mubr.bf16.mxu1 %v3577_v16  ;;  %v3253_v31 = vld [vmem:[#allocation11 + $0x70] sm:$0xff]  }
 0xaf9   : > { %1919 = vmatprep.subr.bf16.mxu1 %v3209_v9  ;;  %v3265_v9 = vld [vmem:[#allocation11 + $0x58] sm:$0xff]  }
 0xafc   : > { %1920 = vmatpush1.bf16.msra.mxu1 %v3207_v11  ;;  %v3267_v11 = vld [vmem:[#allocation11 + $0x18] sm:$0xff]  }
 0xafd   : > { %1921 = vmatprep.subr.bf16.mxu1 %v3215_v13  ;;  %v3269_v13 = vld [vmem:[#allocation11 + $0x50] sm:$0xff]  }
 0xb00   : > { %1922 = vmatpush1.bf16.msra.mxu1 %v3213_v15  ;;  %v3271_v15 = vld [vmem:[#allocation11 + $0x10] sm:$0xff]  }
 0xb01   : > { %1923 = vmatprep.subr.bf16.mxu1 %v3221_v52  ;;  %v3274_v52 = vld [vmem:[#allocation11 + $0xc8] sm:$0xff]  }
 0xb04   : > { %1924 = vmatpush1.bf16.msra.mxu1 %v3219_v51  ;;  %v3273_v51 = vld [vmem:[#allocation11 + $0x48] sm:$0xff]  }
 0xb05   : > { %1925 = vmatprep.subr.bf16.mxu1 %v3227_v25  ;;  %v3277_v25 = vld [vmem:[#allocation11 + $0x40] sm:$0xff]  }
 0xb08   : > { %1926 = vmatpush1.bf16.msra.mxu1 %v3225_v26  ;;  %v3279_v26 = vld [vmem:[#allocation11] sm:$0xff]  }
 0xb09   : > { %1927 = vmatprep.subr.bf16.mxu1 %v3233_v29  ;;  %v1737_v29 = vlaneseq }
 0xb0c   : > { %1928 = vmatpush1.bf16.msra.mxu1 %v3231_v43 }
 0xb0d   : > { %1929 = vmatprep.subr.bf16.mxu1 %v3239_v46 }
 0xb10   : > { %1930 = vmatpush1.bf16.msra.mxu1 %v3237_v48 }
 0xb11   : > { %1931 = vmatprep.subr.bf16.mxu1 %v3245_v55 }
 0xb14   : > { %1932 = vmatpush1.bf16.msra.mxu1 %v3243_v18 }
 0xbb7   : > { %v1527_v23 = vpop.f32.mrf.mxu1 }
 0xbb8   : > { %1536 = vrot.lane.b32.xlu1 %v1527_v23, %s3576_s17 }
 0xbb9   : > { %v3045_v24 = vpop.f32.mrf.mxu1 }
 0xbbb   : > { %v1530_v38 = vpop.f32.mrf.mxu1 }
 0xbbc   : > { %1538 = vrot.lane.b32.xlu1 %v1530_v38, %s3576_s17  ;;  %s2830_s17 = sshll.u32 %s3668_s25, 8  ;;  %s3579_s25 = smov [#allocation12]  }
 0xbbd   : > { %v3046_v39 = vpop.f32.mrf.mxu1  ;;  %s4182_s4 = scalar_lea.hbm %s4238_s12, %s2830_s17  ;;  %s3491_s15 = sshll.u32 %s3579_s25, 4  ;;  %s3492_s15 = int_to_ptr.vmem [resolvable:$false] %s3491_s15 }
 0xbbe   : > { %s3493_s28 = scalar_lea.vmem %s3492_s15, 512  ;;  %p3494_p9 = scmp.lt.s32.totalorder %s4177_s20, %s3492_s15 }
 0xbbf   : > { %p3495_p0 = scmp.lt.s32.totalorder %s3493_s28, %s3487_s21 }
 0xbc1   : > { %p3496_p10 = por %p3495_p0, %p3494_p9 }
 0xbc3   : > { %p3497_p3 = pnand %p3496_p10, %p3490_p7 }
 0xc2a   : > { %v1537_v40 = vpop.permute.xlu1 %1536 }
 0xc2b   : > { %1543 = vst.msk [vmem:[#allocation2] sm:$0xff] %vm1542_vm5, %v1537_v40 }
 0xc2e   : > { %v1539_v41 = vpop.permute.xlu1 %1538 }
 0xc2f   : > { %1544 = vst.msk [vmem:[#allocation2 + $0x8] sm:$0xff] %vm1542_vm5, %v1539_v41  ;;  %v2757_v41 = vld [vmem:[%s4232_s6] ss:$0 sm:$0xff] }
 0xc32   : > { %v1545_v42 = vld [vmem:[#allocation2] sm:$0xff] }
 0xc36   : > { %v1546_v45 = vld [vmem:[#allocation2 + $0x8] sm:$0xff] }
 0xc37   : > { %v1547_v62 = vpack.c.bf16 %v1546_v45, %v1545_v42 }
 0xc39   : > { %3064 = vmatmul.mubr.bf16.vlgmr.msra.gmra.mxu0 %v1547_v62 }
 0xc3a   : > { %1961 = vmatpush1.bf16.msra.mxu0 %v3204_v33  ;;  %1992 = vmatprep.mubr.bf16.mxu0 %v3577_v16  ;;  %v3255_v33 = vld [vmem:[#allocation11 + $0x30] sm:$0xff]  }
 0xc3b   : > { %1962 = vmatprep.subr.bf16.mxu0 %v3212_v10  ;;  %v3266_v10 = vld [vmem:[#allocation11 + $0xd8] sm:$0xff]  }
 0xc3e   : > { %1963 = vmatpush1.bf16.msra.mxu0 %v3210_v12  ;;  %v3268_v12 = vld [vmem:[#allocation11 + $0x98] sm:$0xff]  }
 0xc3f   : > { %1964 = vmatprep.subr.bf16.mxu0 %v3218_v14  ;;  %v3270_v14 = vld [vmem:[#allocation11 + $0xd0] sm:$0xff]  }
 0xc42   : > { %1965 = vmatpush1.bf16.msra.mxu0 %v3216_v50  ;;  %v3272_v50 = vld [vmem:[#allocation11 + $0x90] sm:$0xff]  }
 0xc43   : > { %1966 = vmatprep.subr.bf16.mxu0 %v3224_v54  ;;  %v3276_v54 = vld [vmem:[#allocation11 + $0x88] sm:$0xff]  }
 0xc46   : > { %1967 = vmatpush1.bf16.msra.mxu0 %v3222_v53  ;;  %v3275_v53 = vld [vmem:[#allocation11 + $0x8] sm:$0xff]  }
 0xc47   : > { %1968 = vmatprep.subr.bf16.mxu0 %v3230_v27  ;;  %v3278_v27 = vld [vmem:[#allocation11 + $0xc0] sm:$0xff]  }
 0xc4a   : > { %1969 = vmatpush1.bf16.msra.mxu0 %v3228_v28  ;;  %v3280_v28 = vld [vmem:[#allocation11 + $0x80] sm:$0xff]  }
 0xc4b   : > { %1970 = vmatprep.subr.bf16.mxu0 %v3236_v30  ;;  %v1738_v30 = vshrl.u32 %v1737_v29, 7 }
 0xc4d   : > { %v1739_v16 = vsub.s32 0, %v1738_v30  ;;  %v1747_v43 = vsub.s32 2, %v1738_v30  ;;  %v1743_v46 = vsub.s32 1, %v1738_v30 }
 0xc4e   : > { %1971 = vmatpush1.bf16.msra.mxu0 %v3234_v44  ;;  %v1735_v44 = vld [vmem:[%s4235_s9] sm:$0xf] }
 0xc4f   : > { %1972 = vmatprep.subr.bf16.mxu0 %v3242_v47  ;;  %v1751_v47 = vsub.s32 3, %v1738_v30  ;;  %v1740_v48 = vrot.slane %v1735_v44, %v1739_v16  ;;  %v1744_v18 = vrot.slane %v1735_v44, %v1743_v46 }
 0xc52   : > { %1973 = vmatpush1.bf16.msra.mxu0 %v3240_v49  ;;  %v1748_v49 = vrot.slane %v1735_v44, %v1747_v43 }
 0xc53   : > { %1974 = vmatprep.subr.bf16.mxu0 %v3248_v17 }
 0xc56   : > { %1975 = vmatpush1.bf16.msra.mxu0 %v3246_v19  ;;  %v1752_v19 = vrot.slane %v1735_v44, %v1751_v47 }
 0xcf9   : > { %v1653_v63 = vpop.f32.mrf.mxu0 }
 0xcfa   : > { %v1654_v0 = vadd.f32 %v2748_v37, %v1653_v63 }
 0xcfb   : > { %v3065_v1 = vpop.f32.mrf.mxu0 }
 0xcfc   : > { %v4006_v56 = vadd.f32 %v3353_v2, %v1654_v0 }
 0xcfd   : > { %v1656_v57 = vpop.f32.mrf.mxu0 }
 0xcfe   : > { %v1657_v58 = vadd.f32 %v2748_v37, %v1656_v57  ;;  %1664 = vadd.xlane.f32.xlu1 %v4006_v56  ;;  %v2758_v37 = vld [vmem:[%s4233_s7] ss:$0 sm:$0xff]  ;;  %v3249_v57 = vld [vmem:[#allocation11 + $0x78] sm:$0xff]  }
 0xcff   : > { %v3066_v59 = vpop.f32.mrf.mxu0  ;;  %2889 = vmatprep.subr.bf16.mxu1 %v3249_v57 }
 0xd00   : > { %v4010_v61 = vadd.f32 %v3354_v60, %v1657_v58  ;;  %v3250_v58 = vld [vmem:[#allocation11 + $0xf8] sm:$0xff]  }
 0xd01   : > { %v3251_v59 = vld [vmem:[#allocation11 + $0x38] sm:$0xff]   ;;  %2911 = vmatprep.subr.bf16.mxu0 %v3250_v58 }
 0xd02   : > { %1666 = vadd.xlane.f32.xlu0 %v4010_v61  ;;  %v3252_v60 = vld [vmem:[#allocation11 + $0xb8] sm:$0xff]  }
 0xd87   : > { %v1665_v35 = vpop.xlane.xlu1 %1664 }
 0xd88   : > { %v1668_v36 = vmul.f32 0.0078125, %v1665_v35  ;;  %v3257_v35 = vld [vmem:[#allocation11 + $0x68] sm:$0xff]  }
 0xd8a   : > { %v4014_v3 = vsub.f32 %v4006_v56, %v1668_v36  ;;  %v3258_v36 = vld [vmem:[#allocation11 + $0xe8] sm:$0xff]  }
 0xd8b   : > { %v1667_v4 = vpop.xlane.xlu0 %1666 }
 0xd8c   : > { %v1669_v5 = vmul.f32 0.0078125, %v1667_v4  ;;  %v1672_v6 = vmul.f32 %v4014_v3, %v4014_v3  ;;  %v3260_v4 = vld [vmem:[#allocation11 + $0xa8] sm:$0xff]  }
 0xd8e   : > { %v4019_v7 = vsub.f32 %v4010_v61, %v1669_v5  ;;  %1674 = vadd.xlane.f32.xlu0 %v1672_v6  ;;  %v3261_v5 = vld [vmem:[#allocation11 + $0x60] sm:$0xff]  }
 0xd8f   : > { %v3262_v6 = vld [vmem:[#allocation11 + $0xe0] sm:$0xff]  }
 0xd90   : > { %v1673_v8 = vmul.f32 %v4019_v7, %v4019_v7 }
 0xd92   : > { %1676 = vadd.xlane.f32.xlu1 %v1673_v8  ;;  %v3264_v8 = vld [vmem:[#allocation11 + $0xa0] sm:$0xff]  }
 0xe17   : > { %v1675_v20 = vpop.xlane.xlu0 %1674 }
 0xe18   : > { %v1678_v21 = vmul.f32 0.0078125, %v1675_v20 }
 0xe1a   : > { %v1680_v22 = vadd.f32 1e-05, %v1678_v21 }
 0xe1b   : > { %v1677_v23 = vpop.xlane.xlu1 %1676 }
 0xe1c   : > { %3317 = vrsqrt.f32 %v1680_v22  ;;  %v1679_v24 = vmul.f32 0.0078125, %v1677_v23 }
 0xe1e   : > { %v1681_v38 = vadd.f32 1e-05, %v1679_v24 }
 0xe20   : > { %3319 = vrsqrt.f32 %v1681_v38 }
 0xe29   : > { %v3318_v39 = vpop.eup %3317 }
 0xe2a   : > { %v1684_v40 = vmul.f32 %v3318_v39, %v4014_v3  ;;  %v3259_v3 = vld [vmem:[#allocation11 + $0x28] sm:$0xff]  }
 0xe2c   : > { %v1692_v62 = vmul.f32 %v2757_v41, %v1684_v40 }
 0xe2d   : > { %v3320_v42 = vpop.eup %3319 }
 0xe2e   : > { %v1685_v45 = vmul.f32 %v3320_v42, %v4019_v7  ;;  %v1700_v0 = vadd.f32 %v2758_v37, %v1692_v62  ;;  %v3263_v7 = vld [vmem:[#allocation11 + $0x20] sm:$0xff]  }
 0xe30   : > { %v1693_v63 = vmul.f32 %v2757_v41, %v1685_v45 }
 0xe32   : > { %v1701_v1 = vadd.f32 %v2758_v37, %v1693_v63 }
 0xe34   : > { %v1702_v2 = vpack.c.bf16 %v1701_v1, %v1700_v0 }
 0xe36   : > { %1950 = vmatmul.mubr.bf16.vlgmr.msra.gmra.mxu1 %v1702_v2  ;;  %1993 = vmatmul.mubr.bf16.vlgmr.msra.gmra.mxu0 %v1702_v2 }
 0xe37   : > { %2890 = vmatpush3.bf16.msra.mxu1 %v3251_v59  ;;  %2912 = vmatpush3.bf16.msra.mxu0 %v3252_v60 }
 0xe38   : > { %2891 = vmatprep.subr.bf16.mxu1 %v3253_v31  ;;  %2913 = vmatprep.subr.bf16.mxu0 %v3254_v32 }
 0xe3b   : > { %2892 = vmatpush3.bf16.msra.mxu1 %v3255_v33  ;;  %2914 = vmatpush3.bf16.msra.mxu0 %v3256_v34 }
 0xe3c   : > { %2893 = vmatprep.subr.bf16.mxu1 %v3257_v35  ;;  %2915 = vmatprep.subr.bf16.mxu0 %v3258_v36 }
 0xe3f   : > { %2894 = vmatpush3.bf16.msra.mxu1 %v3259_v3  ;;  %2916 = vmatpush3.bf16.msra.mxu0 %v3260_v4 }
 0xe40   : > { %2895 = vmatprep.subr.bf16.mxu1 %v3261_v5  ;;  %2917 = vmatprep.subr.bf16.mxu0 %v3262_v6 }
 0xe43   : > { %2896 = vmatpush3.bf16.msra.mxu1 %v3263_v7  ;;  %2918 = vmatpush3.bf16.msra.mxu0 %v3264_v8 }
 0xe44   : > { %2897 = vmatprep.subr.bf16.mxu1 %v3265_v9  ;;  %2919 = vmatprep.subr.bf16.mxu0 %v3266_v10 }
 0xe47   : > { %2898 = vmatpush3.bf16.msra.mxu1 %v3267_v11  ;;  %2920 = vmatpush3.bf16.msra.mxu0 %v3268_v12 }
 0xe48   : > { %2899 = vmatprep.subr.bf16.mxu1 %v3269_v13  ;;  %2921 = vmatprep.subr.bf16.mxu0 %v3270_v14 }
 0xe4b   : > { %2900 = vmatpush3.bf16.msra.mxu1 %v3271_v15  ;;  %2922 = vmatpush3.bf16.msra.mxu0 %v3272_v50 }
 0xe4c   : > { %2901 = vmatprep.subr.bf16.mxu1 %v3273_v51  ;;  %2923 = vmatprep.subr.bf16.mxu0 %v3274_v52 }
 0xe4f   : > { %2902 = vmatpush3.bf16.msra.mxu1 %v3275_v53  ;;  %2924 = vmatpush3.bf16.msra.mxu0 %v3276_v54 }
 0xe50   : > { %2903 = vmatprep.subr.bf16.mxu1 %v3277_v25  ;;  %2925 = vmatprep.subr.bf16.mxu0 %v3278_v27 }
 0xe53   : > { %2904 = vmatpush3.bf16.msra.mxu1 %v3279_v26  ;;  %2926 = vmatpush3.bf16.msra.mxu0 %v3280_v28 }
 0xef6   : > { %v1951_v55 = vpop.f32.mrf.mxu1  ;;  %v1994_v17 = vpop.f32.mrf.mxu0 }
 0xef7   : > { %v4034_v20 = vadd.f32 %v1951_v55, %v1740_v48  ;;  %v4036_v21 = vadd.f32 %v1994_v17, %v1748_v49 }
 0xef8   : > { %v1953_v22 = vpop.f32.mrf.mxu1  ;;  %v1996_v23 = vpop.f32.mrf.mxu0 }
 0xef9   : > { %v4039_v24 = vmul.f32 0.70710677, %v4034_v20  ;;  %v4042_v38 = vmul.f32 0.70710677, %v4036_v21  ;;  %v4044_v39 = vadd.f32 %v1953_v22, %v1744_v18  ;;  %v4046_v40 = vadd.f32 %v1996_v23, %v1752_v19 }
 0xefa   : > { %v1955_v62 = vpop.f32.mrf.mxu1  ;;  %v1998_v59 = vpop.f32.mrf.mxu0 }
 0xefb   : > { %v2035_v41 = vand.u32 2147483647, %v4039_v24  ;;  %v4050_v42 = vand.u32 2147483647, %v4042_v38  ;;  %v4053_v45 = vmul.f32 0.70710677, %v4044_v39  ;;  %v4061_v33 = vadd.f32 %v1955_v62, %v1740_v48 }
 0xefc   : > { %v4058_v1 = vmul.f32 0.70710677, %v4046_v40  ;;  %v1957_v60 = vpop.f32.mrf.mxu1  ;;  %v4063_v34 = vadd.f32 %v1998_v59, %v1748_v49  ;;  %v2000_v8 = vpop.f32.mrf.mxu0  ;;  %vm2019_vm6 = vcmp.ge.f32.partialorder %v4039_v24, 0.0  ;;  %vm2021_vm8 = vcmp.ge.f32.partialorder %v4042_v38, 0.0 }
 0xefd   : > { %v2043_v37 = vmul.f32 0.3275911, %v2035_v41  ;;  %v2045_v63 = vmul.f32 0.3275911, %v4050_v42  ;;  %v2036_v0 = vand.u32 2147483647, %v4053_v45  ;;  %v4065_v35 = vadd.f32 %v1957_v60, %v1744_v18 }
 0xefe   : > { %v2038_v32 = vand.u32 2147483647, %v4058_v1  ;;  %v4068_v3 = vmul.f32 0.70710677, %v4061_v33  ;;  %v4071_v5 = vmul.f32 0.70710677, %v4063_v34  ;;  %v4079_v12 = vadd.f32 %v2000_v8, %v1752_v19 }
 0xeff   : > { %v2051_v2 = vadd.f32 1.0, %v2043_v37  ;;  %v2053_v57 = vadd.f32 1.0, %v2045_v63  ;;  %v2044_v58 = vmul.f32 0.3275911, %v2036_v0  ;;  %v4075_v7 = vmul.f32 0.70710677, %v4065_v35 }
 0xf00   : > { %v2046_v36 = vmul.f32 0.3275911, %v2038_v32  ;;  %v2039_v6 = vand.u32 2147483647, %v4068_v3  ;;  %v2041_v10 = vand.u32 2147483647, %v4071_v5 }
 0xf01   : > { %3321 = vrcp.f32 %v2051_v2  ;;  %v2052_v31 = vadd.f32 1.0, %v2044_v58  ;;  %v2040_v11 = vand.u32 2147483647, %v4075_v7  ;;  %v2147_v52 = vsub.f32 0.0, %v2035_v41 }
 0xf02   : > { %3323 = vrcp.f32 %v2053_v57  ;;  %v2054_v4 = vadd.f32 1.0, %v2046_v36  ;;  %v2047_v9 = vmul.f32 0.3275911, %v2039_v6  ;;  %v2049_v14 = vmul.f32 0.3275911, %v2041_v10 }
 0xf03   : > { %3325 = vrcp.f32 %v2052_v31  ;;  %v2048_v15 = vmul.f32 0.3275911, %v2040_v11  ;;  %v4084_v54 = vmul.f32 0.70710677, %v4079_v12  ;;  %v2148_v28 = vsub.f32 0.0, %v2036_v0 }
 0xf04   : > { %3327 = vrcp.f32 %v2054_v4  ;;  %v2055_v13 = vadd.f32 1.0, %v2047_v9  ;;  %v2057_v50 = vadd.f32 1.0, %v2049_v14  ;;  %v2151_v30 = vsub.f32 0.0, %v2039_v6 }
 0xf05   : > { %v2056_v53 = vadd.f32 1.0, %v2048_v15  ;;  %v4091_v16 = vand.u32 2147483647, %v4084_v54  ;;  %v2155_v44 = vmul.f32 %v2147_v52, %v2035_v41  ;;  %v2149_v17 = vsub.f32 0.0, %v4050_v42 }
 0xf06   : > { %3329 = vrcp.f32 %v2055_v13  ;;  %v2156_v18 = vmul.f32 %v2148_v28, %v2036_v0  ;;  %v2150_v19 = vsub.f32 0.0, %v2038_v32  ;;  %v2159_v37 = vmul.f32 %v2151_v30, %v2039_v6 }
 0xf07   : > { %3331 = vrcp.f32 %v2057_v50  ;;  %v2050_v49 = vmul.f32 0.3275911, %v4091_v16  ;;  %v2163_v63 = vmul.f32 1.442695, %v2155_v44  ;;  %v2153_v57 = vsub.f32 0.0, %v2041_v10 }
 0xf08   : > { %3333 = vrcp.f32 %v2056_v53  ;;  %v2152_v58 = vsub.f32 0.0, %v2040_v11  ;;  %v2157_v0 = vmul.f32 %v2149_v17, %v4050_v42  ;;  %v2165_v36 = vmul.f32 1.442695, %v2156_v18 }
 0xf09   : > { %v2058_v41 = vadd.f32 1.0, %v2050_v49  ;;  %v2158_v8 = vmul.f32 %v2150_v19, %v2038_v32  ;;  %v2171_v13 = vmul.f32 1.442695, %v2159_v37  ;;  %v2161_v15 = vmul.f32 %v2153_v57, %v2041_v10 }
 0xf0a   : > { %v2160_v50 = vmul.f32 %v2152_v58, %v2040_v11  ;;  %v2167_v42 = vmul.f32 1.442695, %v2157_v0  ;;  %vm2020_vm7 = vcmp.ge.f32.partialorder %v4053_v45, 0.0  ;;  %vm2023_vm9 = vcmp.ge.f32.partialorder %v4068_v3, 0.0 }
 0xf0b   : > { %3335 = vrcp.f32 %v2058_v41  ;;  %v2169_v32 = vmul.f32 1.442695, %v2158_v8  ;;  %vm2022_vm10 = vcmp.ge.f32.partialorder %v4058_v1, 0.0  ;;  %vm2025_vm11 = vcmp.ge.f32.partialorder %v4071_v5, 0.0 }
 0xf0c   : > { %3337 = vpow2.f32 %v2163_v63  ;;  %vm2024_vm12 = vcmp.ge.f32.partialorder %v4075_v7, 0.0  ;;  %vm2026_vm13 = vcmp.ge.f32.partialorder %v4084_v54, 0.0  ;;  %v2009_v54 = vmul.f32 0.5, %v4063_v34 }
 0xf0d   : > { %3339 = vpow2.f32 %v2165_v36 }
 0xf0e   : > { %v4081_v51 = vpop.eup %3321  ;;  %3341 = vpow2.f32 %v2171_v13 }
 0xf0f   : > { %v4086_v25 = vpop.eup %3323  ;;  %v2075_v27 = vmul.f32 1.0614054, %v4081_v51  ;;  %3343 = vpow2.f32 %v2167_v42 }
 0xf10   : > { %v2077_v26 = vmul.f32 1.0614054, %v4086_v25  ;;  %v4093_v43 = vpop.eup %3325  ;;  %3345 = vpow2.f32 %v2169_v32 }
 0xf11   : > { %v2083_v29 = vadd.f32 -1.4531521, %v2075_v27  ;;  %v2076_v48 = vmul.f32 1.0614054, %v4093_v43  ;;  %v4100_v22 = vpop.eup %3327 }
 0xf12   : > { %v2085_v46 = vadd.f32 -1.4531521, %v2077_v26  ;;  %v2078_v2 = vmul.f32 1.0614054, %v4100_v22 }
 0xf13   : > { %v2091_v47 = vmul.f32 %v4081_v51, %v2083_v29  ;;  %v2084_v62 = vadd.f32 -1.4531521, %v2076_v48  ;;  %v4106_v6 = vpop.eup %3329  ;;  %v2173_v48 = vmul.f32 1.442695, %v2160_v50 }
 0xf14   : > { %v2093_v55 = vmul.f32 %v4086_v25, %v2085_v46  ;;  %v2086_v4 = vadd.f32 -1.4531521, %v2078_v2  ;;  %v2079_v26 = vmul.f32 1.0614054, %v4106_v6  ;;  %v4112_v29 = vpop.eup %3331  ;;  %v2154_v46 = vsub.f32 0.0, %v4091_v16 }
 0xf15   : > { %v2099_v23 = vadd.f32 1.4214138, %v2091_v47  ;;  %v2092_v31 = vmul.f32 %v4093_v43, %v2084_v62  ;;  %v2081_v11 = vmul.f32 1.0614054, %v4112_v29  ;;  %v2175_v47 = vmul.f32 1.442695, %v2161_v15  ;;  %v4117_v49 = vpop.eup %3333 }
 0xf16   : > { %v2101_v60 = vadd.f32 1.4214138, %v2093_v55  ;;  %v2094_v14 = vmul.f32 %v4100_v22, %v2086_v4  ;;  %v2087_v44 = vadd.f32 -1.4531521, %v2079_v26  ;;  %v2080_v37 = vmul.f32 1.0614054, %v4117_v49 }
 0xf17   : > { %v2107_v59 = vmul.f32 %v4081_v51, %v2099_v23  ;;  %v2100_v9 = vadd.f32 1.4214138, %v2092_v31  ;;  %v2089_v62 = vadd.f32 -1.4531521, %v2081_v11  ;;  %v2162_v63 = vmul.f32 %v2154_v46, %v4091_v16 }
 0xf18   : > { %v2109_v53 = vmul.f32 %v4086_v25, %v2101_v60  ;;  %v2102_v28 = vadd.f32 1.4214138, %v2094_v14  ;;  %v2095_v19 = vmul.f32 %v4106_v6, %v2087_v44  ;;  %3347 = vpow2.f32 %v2175_v47  ;;  %v4127_v0 = vpop.eup %3335 }
 0xf19   : > { %v2115_v52 = vadd.f32 -0.28449672, %v2107_v59  ;;  %v2108_v27 = vmul.f32 %v4093_v43, %v2100_v9  ;;  %v2097_v57 = vmul.f32 %v4112_v29, %v2089_v62  ;;  %v2088_v58 = vadd.f32 -1.4531521, %v2080_v37 }
 0xf1a   : > { %v2110_v10 = vmul.f32 %v4100_v22, %v2102_v28  ;;  %v2117_v17 = vadd.f32 -0.28449672, %v2109_v53  ;;  %v2103_v41 = vadd.f32 1.4214138, %v2095_v19  ;;  %3349 = vpow2.f32 %v2173_v48 }
 0xf1b   : > { %v2116_v30 = vadd.f32 -0.28449672, %v2108_v27  ;;  %v2123_v55 = vmul.f32 %v4081_v51, %v2115_v52  ;;  %v2105_v4 = vadd.f32 1.4214138, %v2097_v57  ;;  %v2096_v8 = vmul.f32 %v4117_v49, %v2088_v58  ;;  %v3338_v52 = vpop.eup %3337 }
 0xf1c   : > { %v2118_v23 = vadd.f32 -0.28449672, %v2110_v10  ;;  %v2111_v31 = vmul.f32 %v4106_v6, %v2103_v41  ;;  %v2125_v36 = vmul.f32 %v4086_v25, %v2117_v17  ;;  %v2082_v16 = vmul.f32 1.0614054, %v4127_v0  ;;  %v3340_v44 = vpop.eup %3339 }
 0xf1d   : > { %v2124_v18 = vmul.f32 %v4093_v43, %v2116_v30  ;;  %v2131_v59 = vadd.f32 0.2548296, %v2123_v55  ;;  %v2177_v13 = vmul.f32 1.442695, %v2162_v63  ;;  %v2113_v15 = vmul.f32 %v4112_v29, %v2105_v4  ;;  %v3342_v10 = vpop.eup %3341 }
 0xf1e   : > { %v2126_v60 = vmul.f32 %v4100_v22, %v2118_v23  ;;  %v2119_v9 = vadd.f32 -0.28449672, %v2111_v31  ;;  %v2104_v50 = vadd.f32 1.4214138, %v2096_v8  ;;  %v2090_v42 = vadd.f32 -1.4531521, %v2082_v16  ;;  %v3344_v37 = vpop.eup %3343 }
 0xf1f   : > { %v2132_v2 = vadd.f32 0.2548296, %v2124_v18  ;;  %v2139_v53 = vmul.f32 %v4081_v51, %v2131_v59  ;;  %v2133_v28 = vadd.f32 0.2548296, %v2125_v36  ;;  %v2121_v32 = vadd.f32 -0.28449672, %v2113_v15  ;;  %v3346_v57 = vpop.eup %3345 }
 0xf20   : > { %v2134_v27 = vadd.f32 0.2548296, %v2126_v60  ;;  %v2127_v26 = vmul.f32 %v4106_v6, %v2119_v9  ;;  %v2112_v30 = vmul.f32 %v4117_v49, %v2104_v50  ;;  %3351 = vpow2.f32 %v2177_v13 }
 0xf21   : > { %v2140_v14 = vmul.f32 %v4093_v43, %v2132_v2  ;;  %v2098_v43 = vmul.f32 %v4127_v0, %v2090_v42  ;;  %v2129_v51 = vmul.f32 %v4112_v29, %v2121_v32  ;;  %v2179_v48 = vmul.f32 %v3338_v52, %v2139_v53 }
 0xf22   : > { %v2135_v46 = vadd.f32 0.2548296, %v2127_v26  ;;  %v2120_v47 = vadd.f32 -0.28449672, %v2112_v30  ;;  %v2142_v55 = vmul.f32 %v4100_v22, %v2134_v27  ;;  %v2141_v19 = vmul.f32 %v4086_v25, %v2133_v28 }
 0xf23   : > { %v2180_v11 = vmul.f32 %v3340_v44, %v2140_v14  ;;  %v2106_v18 = vadd.f32 1.4214138, %v2098_v43  ;;  %v2137_v23 = vadd.f32 0.2548296, %v2129_v51  ;;  %v3578_v41 = vmov -1.0  }
 0xf24   : > { %v2143_v17 = vmul.f32 %v4106_v6, %v2135_v46  ;;  %v2128_v62 = vmul.f32 %v4117_v49, %v2120_v47  ;;  %v2027_v63 = vsel %vm2019_vm6, 1.0, %v3578_v41  ;;  %v2028_v6 = vsel %vm2020_vm7, 1.0, %v3578_v41 }
 0xf25   : > { %v2114_v22 = vmul.f32 %v4127_v0, %v2106_v18  ;;  %v2188_v58 = vsub.f32 1.0, %v2180_v11  ;;  %v2145_v25 = vmul.f32 %v4112_v29, %v2137_v23  ;;  %v3348_v60 = vpop.eup %3347  ;;  %v2187_v31 = vsub.f32 1.0, %v2179_v48 }
 0xf26   : > { %v2183_v2 = vmul.f32 %v3342_v10, %v2143_v17  ;;  %v2136_v59 = vadd.f32 0.2548296, %v2128_v62  ;;  %v2182_v36 = vmul.f32 %v3346_v57, %v2142_v55  ;;  %v2181_v24 = vmul.f32 %v3344_v37, %v2141_v19 }
 0xf27   : > { %v2122_v8 = vadd.f32 -0.28449672, %v2114_v22  ;;  %v2031_v9 = vsel %vm2023_vm9, 1.0, %v3578_v41  ;;  %v2185_v16 = vmul.f32 %v3348_v60, %v2145_v25  ;;  %v3350_v13 = vpop.eup %3349  ;;  %v2196_v29 = vmul.f32 %v2188_v58, %v2028_v6 }
 0xf28   : > { %v2191_v4 = vsub.f32 1.0, %v2183_v2  ;;  %v2144_v3 = vmul.f32 %v4117_v49, %v2136_v59  ;;  %v2195_v52 = vmul.f32 %v2187_v31, %v2027_v63  ;;  %v2190_v53 = vsub.f32 1.0, %v2182_v36 }
 0xf29   : > { %v2130_v45 = vmul.f32 %v4127_v0, %v2122_v8  ;;  %v2193_v15 = vsub.f32 1.0, %v2185_v16  ;;  %v2029_v26 = vsel %vm2021_vm8, 1.0, %v3578_v41  ;;  %v2189_v49 = vsub.f32 1.0, %v2181_v24 }
 0xf2a   : > { %v2199_v14 = vmul.f32 %v2191_v4, %v2031_v9  ;;  %v2184_v50 = vmul.f32 %v3350_v13, %v2144_v3  ;;  %v2030_v42 = vsel %vm2022_vm10, 1.0, %v3578_v41  ;;  %v2033_v32 = vsel %vm2025_vm11, 1.0, %v3578_v41 }
 0xf2b   : > { %v2138_v27 = vadd.f32 0.2548296, %v2130_v45  ;;  %v2032_v30 = vsel %vm2024_vm12, 1.0, %v3578_v41  ;;  %v2204_v46 = vadd.f32 1.0, %v2196_v29  ;;  %v2007_v43 = vmul.f32 0.5, %v4061_v33 }
 0xf2c   : > { %v2192_v28 = vsub.f32 1.0, %v2184_v50  ;;  %v2207_v1 = vadd.f32 1.0, %v2199_v14  ;;  %v2201_v7 = vmul.f32 %v2193_v15, %v2033_v32  ;;  %v2203_v11 = vadd.f32 1.0, %v2195_v52 }
 0xf2d   : > { %v2146_v5 = vmul.f32 %v4127_v0, %v2138_v27  ;;  %v3352_v44 = vpop.eup %3351  ;;  %v2198_v51 = vmul.f32 %v2190_v53, %v2030_v42  ;;  %v2197_v47 = vmul.f32 %v2189_v49, %v2029_v26  ;;  %v2004_v48 = vmul.f32 0.5, %v4044_v39 }
 0xf2e   : > { %v2200_v10 = vmul.f32 %v2192_v28, %v2032_v30  ;;  %v2008_v55 = vmul.f32 0.5, %v4065_v35  ;;  %v2003_v18 = vmul.f32 0.5, %v4034_v20  ;;  %v2215_v0 = vmul.f32 %v2207_v1, %v2007_v43 }
 0xf2f   : > { %v2186_v38 = vmul.f32 %v3352_v44, %v2146_v5  ;;  %v2212_v23 = vmul.f32 %v2204_v46, %v2004_v48  ;;  %v2209_v62 = vadd.f32 1.0, %v2201_v7  ;;  %v2034_v37 = vsel %vm2026_vm13, 1.0, %v3578_v41 }
 0xf30   : > { %v2208_v17 = vadd.f32 1.0, %v2200_v10  ;;  %v2211_v63 = vmul.f32 %v2203_v11, %v2003_v18  ;;  %v2206_v2 = vadd.f32 1.0, %v2198_v51  ;;  %v2205_v57 = vadd.f32 1.0, %v2197_v47 }
 0xf31   : > { %v2194_v19 = vsub.f32 1.0, %v2186_v38  ;;  %v2006_v39 = vmul.f32 0.5, %v4046_v40  ;;  %v2010_v35 = vmul.f32 0.5, %v4079_v12  ;;  %v2005_v20 = vmul.f32 0.5, %v4036_v21  ;;  %v2791_v40 = vld [vmem:[%s4237_s11] ss:$0 sm:$0xff] }
 0xf32   : > { %v2216_v33 = vmul.f32 %v2208_v17, %v2008_v55  ;;  %v2219_v58 = vpack.c.bf16 %v2215_v0, %v2211_v63  ;;  %v2217_v59 = vmul.f32 %v2209_v62, %v2009_v54 }
 0xf33   : > { %v2202_v22 = vmul.f32 %v2194_v19, %v2034_v37  ;;  %v2214_v60 = vmul.f32 %v2206_v2, %v2006_v39  ;;  %v2213_v41 = vmul.f32 %v2205_v57, %v2005_v20 }
 0xf34   : > { %v2220_v6 = vpack.c.bf16 %v2216_v33, %v2212_v23 }
 0xf35   : > { %v2210_v25 = vadd.f32 1.0, %v2202_v22  ;;  %v2221_v4 = vpack.c.bf16 %v2217_v59, %v2213_v41 }
 0xf36   : > { %2518 = vmatprep.mubr.bf16.mxu1 %v2220_v6 }
 0xf37   : > { %v2218_v31 = vmul.f32 %v2210_v25, %v2010_v35  ;;  %2519 = vmatmul.mubr.bf16.vlgmr.msra.gmra.mxu1 %v2219_v58 }
 0xf39   : > { %v2222_v36 = vpack.c.bf16 %v2218_v31, %v2214_v60 }
 0xf3b   : > { %2559 = vmatprep.mubr.bf16.mxu0 %v2222_v36 }
 0xf3c   : > { %2560 = vmatmul.mubr.bf16.vlgmr.msra.gmra.mxu0 %v2221_v4 }
 0xff7   : > { %v2905_v34 = vpop.f32.mrf.mxu1 }
 0xff9   : > { %v2906_v8 = vpop.f32.mrf.mxu1 }
 0xffa   : > { %v2907_v12 = vadd.f32 %v2906_v8, %v2905_v34 }
 0xffb   : > { %v2908_v21 = vpop.f32.mrf.mxu1 }
 0xffc   : > { %v2927_v24 = vpop.f32.mrf.mxu0  ;;  %v2521_v9 = vadd.f32 %v2907_v12, %v2791_v40 }
 0xffd   : > { %v2909_v16 = vpop.f32.mrf.mxu1 }
 0xffe   : > { %v2928_v3 = vpop.f32.mrf.mxu0  ;;  %v2910_v13 = vadd.f32 %v2909_v16, %v2908_v21 }
 0xfff   : > { %v2929_v14 = vadd.f32 %v2928_v3, %v2927_v24 }
0x1000   : > { %v2930_v45 = vpop.f32.mrf.mxu0  ;;  %v2524_v15 = vadd.f32 %v2910_v13, %v2791_v40 }
0x1001   : > { %v2562_v29 = vadd.f32 %v2929_v14, %v2521_v9 }
0x1002   : > { %v2931_v50 = vpop.f32.mrf.mxu0 }
0x1003   : > { %v2568_v52 = vadd.f32 %v2562_v29, %v4006_v56  ;;  %v2932_v53 = vadd.f32 %v2931_v50, %v2930_v45 }
0x1005   : > { %2570 = vst [vmem:[%s489_s14] sm:$0xff] %v2568_v52  ;;  %v2565_v27 = vadd.f32 %v2932_v53, %v2524_v15 }
0x1007   : > { %v2569_v26 = vadd.f32 %v2565_v27, %v4010_v61 }
0x1009   : > { %2571 = vst [vmem:[%s489_s14 + $0x8] sm:$0xff] %v2569_v26 }
0x100a   : > { %3500 = shalt.err (!%p3497_p3)
}
0x100b   : > { %s3501_s3 = scalar_lea.hbm %s4182_s4, 256  ;;  %s3505_s19 = scalar_lea.hbm %s4238_s12, 512 }
0x100c   : > { %p3502_p5 = scmp.ne.s32.totalorder %s4182_s4, %s3501_s3  ;;  %p3506_p8 = scmp.lt.s32.totalorder %s4182_s4, %s4238_s12 }
0x100d   : > { %p3507_p13 = scmp.lt.s32.totalorder %s3505_s19, %s3501_s3 }
0x100e   : > { %p3503_p4 = pnand %p3502_p5, %p4274_p2 }
0x100f   : > { %p3508_p11 = por %p3507_p13, %p3506_p8 }
0x1010   : > { %p3504_p6 = pneg %p3503_p4 }
0x1012   : > { %p3509_p1 = pnand %p3508_p11, %p3504_p6 }
0x1014   : > { %3512 = shalt.err (!%p3509_p1)
}
0x1015   : > { %s3580_s30 = smov 128   ;;  %s3581_s18 = smov 8  }
0x1016   : > { %3085 = dma.vmem_to_hbm [thread:$0]  (%p4274_p2), %s4177_s20, 256, %s4182_s4, %s2573_s10, %s3580_s30, %s3580_s30, %s3581_s18  }
0x1017 PF: > { %s4275_s21 = sld [smem:[#allocation17_spill]]  ;;  %p4278_p7 = scmp.ge.s32.totalorder %s3559_s24, 2 }
0x1018   : > { %s4276_s25 = sld [smem:[#allocation18_spill]] }
0x101d   : > { %s2601_s15 = sand.u32 1, %s4275_s21  }
0x101e   : > { %p4277_p12 = scmp.ne.s32.totalorder %s4276_s25, 0  ;;  %s2602_s28 = scalar_lea.sflag [#allocation5], %s2601_s15 }
0x1020   : > { %p3105_p9 = pnand %p4278_p7, %p4277_p12 }
0x1022   : > { %p3106_p0 = pneg %p3105_p9 }
0x1024   : > { %3542 = dma.done.wait (%p3106_p0), %s2602_s28, 256  }
0x1025   : > { %3544 = vsyncadd (%p3106_p0), %s2602_s28, 4294967040  ;;  %p27_p10 = scmp.ge.s32.totalorder %s3744_s13, 4   ;;  %s4279_s21 = smov %s3551_s22 }
0x1026   : > { %s4280_s22 = smov %s3555_s23  ;;  %s4281_s23 = smov %s3753_s26 }
0x1027   : > { %s4282_s24 = smov %s3744_s13  ;;  %29 = sbr.rel (!%p27_p10) target bundleno = 12 (0xc), region = 129 }
0x102c   :  { %2607 = vsyncpa [#allocation4], 1 }
0x102d   :  { %2609 = vsyncpa [#allocation4 + $0x1], 1 }
0x102e   :  { %2610 = vsyncpa [#allocation7], 1 }
0x102f   :  { %2611 = vsyncpa [#allocation10], 1 }
0x1030   :  { %2612 = vsyncpa [#allocation5], 1 }
0x1031   :  { %2614 = vsyncpa [#allocation5 + $0x1], 1 }

</bundles_post_ra>
